<compile_context>
chip_gen: v6e
topology: v6e:2x2x1
jax: 0.10.0
libtpu: 0.0.40
codegen_flags: <defaults>
</compile_context>

<pallas_src>
import math
from typing import NamedTuple

import jax
import jax.numpy as jnp
from jax.experimental import pallas as pl
from jax.experimental.pallas import tpu as pltpu

_NEG_BIG = -1e30  # bias for padded vocab columns: exp underflows to exactly 0


def _round_up(a: int, b: int) -> int:
    return (a + b - 1) // b * b


def _cdiv(a: int, b: int) -> int:
    return (a + b - 1) // b


def _vmem_capacity_bytes() -> int:
    try:
        return int(pltpu.get_tpu_info().vmem_capacity_bytes)
    except Exception:
        return 64 << 20  # conservative (v7x-sized) fallback


class GeneratorParams(NamedTuple):
    weight_t: jax.Array      # (d_model, vocab_pad), compute dtype, zero-padded cols
    bias2d: jax.Array        # (1, vocab_pad), f32, padded cols = -1e30
    vocab: int
    vocab_pad: int
    tn: int                  # vocab (lane) tile width; vocab_pad % tn == 0
    compute_dtype: jnp.dtype


def prepare_generator_params(weight, bias, *, tn=None,
                             compute_dtype=jnp.bfloat16,
                             vmem_budget_bytes=None) -> GeneratorParams:
    """One-time layout prep (transpose + pad + cast), hoisted out of the hot path.

    weight: (vocab, d_model)  -- nn.Linear weight
    bias:   (vocab,)
    """
    vocab, d_model = weight.shape
    assert bias.shape == (vocab,)

    budget = vmem_budget_bytes
    if budget is None:
        budget = (_vmem_capacity_bytes() * 3) // 4

    c_sz = jnp.dtype(compute_dtype).itemsize
    vocab128 = _round_up(vocab, 128)

    if tn is None:
        # Wider vocab tiles amortise the ~0.35us/step grid overhead on v7x.
        tn = 4096 if _vmem_capacity_bytes() <= (80 << 20) else 2048
        # If the whole compute-dtype weight fits comfortably, make it fully
        # resident (nj == 1): its block index never changes across the grid,
        # so it is DMA'd from HBM exactly once.
        if 2 * d_model * vocab128 * c_sz <= budget // 3:
            tn = vocab128

    tn_eff = min(_round_up(tn, 128), vocab128)
    vocab_pad = _round_up(vocab, tn_eff)

    w_t = jnp.asarray(weight, jnp.float32).T  # (d_model, vocab)
    b_p = jnp.asarray(bias, jnp.float32)
    if vocab_pad != vocab:
        w_t = jnp.pad(w_t, ((0, 0), (0, vocab_pad - vocab)))
        b_p = jnp.pad(b_p, (0, vocab_pad - vocab), constant_values=_NEG_BIG)

    return GeneratorParams(
        weight_t=w_t.astype(compute_dtype),
        bias2d=b_p.reshape(1, vocab_pad),
        vocab=vocab,
        vocab_pad=vocab_pad,
        tn=tn_eff,
        compute_dtype=jnp.dtype(compute_dtype),
    )


def _make_generator_kernel(nj: int, tn: int):
    if nj == 1:
        # Fully-resident weight: plain single-tile softmax, no bookkeeping.
        def kernel(x_ref, w_ref, b_ref, out_ref):
            logits = jnp.dot(x_ref[...], w_ref[...],
                             preferred_element_type=jnp.float32) + b_ref[...]
            m = jnp.max(logits, axis=-1, keepdims=True)
            p = jnp.exp(logits - m)
            inv = 1.0 / jnp.sum(p, axis=-1, keepdims=True)  # exact divide
            out_ref[...] = (p * inv).astype(out_ref.dtype)
        return kernel

    def kernel(x_ref, w_ref, b_ref, out_ref, mj_ref, m_ref, l_ref):
        """One (row-tile, vocab-tile) grid step.

        x_ref:   (tm, d_model)    compute dtype (bf16)
        w_ref:   (d_model, tn)    compute dtype (bf16)
        b_ref:   (1, tn)          f32
        out_ref: (tm, vocab_pad)  resident across the vocab axis
        mj_ref:  (nj, tm, 1)      f32: running-max snapshot used to stage tile j
        m_ref:   (tm, 1)          f32 running row max
        l_ref:   (tm, 1)          f32 running sum of exp
        """
        j = pl.program_id(1)

        @pl.when(j == 0)
        def _init():
            m_ref[...] = jnp.full(m_ref.shape, -jnp.inf, m_ref.dtype)
            l_ref[...] = jnp.zeros(l_ref.shape, l_ref.dtype)

        # MXU: bf16 x bf16 -> f32 accumulation; bias added in f32.
        logits = jnp.dot(x_ref[...], w_ref[...],
                         preferred_element_type=jnp.float32) + b_ref[...]

        # Flash-style online max / sum (all f32).
        m_prev = m_ref[...]
        m_new = jnp.maximum(m_prev, jnp.max(logits, axis=-1, keepdims=True))
        p = jnp.exp(logits - m_new)  # <= 1 by construction
        l_ref[...] = l_ref[...] * jnp.exp(m_prev - m_new) + jnp.sum(
            p, axis=-1, keepdims=True)
        m_ref[...] = m_new
        mj_ref[j] = m_new  # snapshot of the max used to stage this tile

        # Stage exp(logits - m_j) directly into the resident output block
        # (lane-dense, 128-aligned dynamic slice).  Rescaled at finalize.
        start = pl.multiple_of(j * tn, 128)
        out_ref[:, pl.ds(start, tn)] = p.astype(out_ref.dtype)

        @pl.when(j == nj - 1)
        def _finalize():
            m_fin = m_ref[...]
            inv = 1.0 / l_ref[...]  # exact divide: rows sum to 1 in f32
            for jj in range(nj):    # static unroll; one VPU mul pass
                sl = slice(jj * tn, (jj + 1) * tn)
                scale = jnp.exp(mj_ref[jj] - m_fin) * inv   # (tm, 1)
                out_ref[:, sl] = (
                    out_ref[:, sl].astype(jnp.float32) * scale
                ).astype(out_ref.dtype)

    return kernel


def generator_forward(x, params: GeneratorParams, *, tm=256,
                      out_dtype=jnp.float32, vmem_budget_bytes=None):
    """softmax(x @ W^T + b, axis=-1) with pre-prepared params.

    x: (..., d_model); returns (..., vocab) in `out_dtype`, rows sum to 1.
    """
    *lead, d_model = x.shape
    assert params.weight_t.shape[0] == d_model

    vocab, vocab_pad, tn = params.vocab, params.vocab_pad, params.tn
    nj = vocab_pad // tn
    M = math.prod(lead) if lead else 1

    vmem_cap = _vmem_capacity_bytes()
    budget = vmem_budget_bytes
    if budget is None:
        budget = (vmem_cap * 3) // 4   # ~96 MiB on v5e/v6e, ~48 MiB on v7x

    c_sz = jnp.dtype(params.compute_dtype).itemsize
    o_sz = jnp.dtype(out_dtype).itemsize

    def vmem_bytes(tm_e):
        tm8 = _round_up(tm_e, 8)
        return (2 * tm8 * d_model * c_sz       # x tile (double buffered)
                + 2 * d_model * tn * c_sz      # weight tile (double buffered)
                + 2 * 8 * tn * 4               # bias tile
                + 2 * tm8 * vocab_pad * o_sz   # resident output block
                + nj * tm8 * 128 * 4           # per-tile running-max snapshots
                + 2 * tm8 * 128 * 4)           # m / l scratch

    # Row tile: multiples of 16 (bf16 sublane packing), shrink only if the
    # working set exceeds the per-generation VMEM budget.  For LLM vocabs on
    # v7x, pass out_dtype=bfloat16 to keep tm at the 256-row MXU height.
    tm_eff = _round_up(min(tm, _round_up(max(M, 1), 16)), 16)
    while vmem_bytes(tm_eff) > budget and tm_eff > 16:
        tm_eff = max(16, _round_up(tm_eff // 2, 16))

    M_pad = _round_up(M, tm_eff)
    # v7x has two TensorCores: give the "parallel" row axis >= 2 programs when
    # there are enough rows, otherwise one core idles.
    if M_pad // tm_eff < 2 and M >= 32:
        tm_eff = _round_up(_cdiv(M, 2), 16)
        M_pad = _round_up(M, tm_eff)

    x2d = jnp.asarray(x, params.compute_dtype).reshape(M, d_model)
    if M_pad != M:
        x2d = jnp.pad(x2d, ((0, M_pad - M), (0, 0)))

    grid = (M_pad // tm_eff, nj)
    kernel = _make_generator_kernel(nj, tn)

    scratch_shapes = []
    if nj > 1:
        scratch_shapes = [
            pltpu.VMEM((nj, tm_eff, 1), jnp.float32),  # per-tile max snapshots
            pltpu.VMEM((tm_eff, 1), jnp.float32),      # running max
            pltpu.VMEM((tm_eff, 1), jnp.float32),      # running sum of exp
        ]

    vmem_limit = int(min(max(vmem_bytes(tm_eff) + (4 << 20), 32 << 20), vmem_cap))

    # TODO(synk): if profiling on v5e shows exposed weight DMA, add
    # pipeline_mode=pl.Buffered(3) to the weight BlockSpec.
    out = pl.pallas_call(
        kernel,
        out_shape=jax.ShapeDtypeStruct((M_pad, vocab_pad), out_dtype),
        grid_spec=pltpu.PrefetchScalarGridSpec(
            num_scalar_prefetch=0,
            grid=grid,
            in_specs=[
                pl.BlockSpec((tm_eff, d_model), lambda i, j: (i, 0)),
                pl.BlockSpec((d_model, tn), lambda i, j: (0, j)),
                pl.BlockSpec((1, tn), lambda i, j: (0, j)),
            ],
            out_specs=pl.BlockSpec((tm_eff, vocab_pad), lambda i, j: (i, 0)),
            scratch_shapes=scratch_shapes,
        ),
        compiler_params=pltpu.CompilerParams(
            dimension_semantics=("parallel", "arbitrary"),
            vmem_limit_bytes=vmem_limit,
        ),
    )(x2d, params.weight_t, params.bias2d)

    out = out[:M, :vocab]
    return out.reshape(*lead, vocab)


if __name__ == "__main__":
    # Small shapes consistent with the module (d_model=512 from demo.py).
    batch, seq, d_model, vocab_size = 2, 8, 512, 1000

    key = jax.random.PRNGKey(0)
    kx, kw, kb = jax.random.split(key, 3)

    x = jax.random.normal(kx, (batch, seq, d_model), dtype=jnp.float32)
    bound = 1.0 / math.sqrt(d_model)
    weight = jax.random.uniform(
        kw, (vocab_size, d_model), minval=-bound, maxval=bound, dtype=jnp.float32
    )
    bias = jax.random.uniform(
        kb, (vocab_size,), minval=-bound, maxval=bound, dtype=jnp.float32
    )

    # One-time layout prep (transpose + pad + bf16 cast), hoisted out of the
    # forward path.
    params = prepare_generator_params(weight, bias)            # nj == 1 fast path
    params_stream = prepare_generator_params(weight, bias, tn=128)  # streamed vocab

    probs = generator_forward(x, params)
    jax.block_until_ready(probs)

    # Exercise the multi-tile vocab streaming + online softmax + finalize path.
    probs_small = generator_forward(x, params_stream, tm=16)
    jax.block_until_ready(probs_small)

    # References.
    ref_f32 = jax.nn.softmax(x @ weight.T + bias, axis=-1)
    logits_bf16 = (
        jnp.dot(
            x.astype(jnp.bfloat16).reshape(-1, d_model),
            weight.T.astype(jnp.bfloat16),
            preferred_element_type=jnp.float32,
        )
        + bias
    )
    ref_bf16 = jax.nn.softmax(logits_bf16, axis=-1).reshape(batch, seq, vocab_size)

    for p in (probs, probs_small):
        assert p.shape == (batch, seq, vocab_size)
        assert bool(jnp.all(p >= 0.0))
        # Exact divide in the kernel: rows sum to 1 within f32 rounding.
        assert jnp.allclose(jnp.sum(p, axis=-1), 1.0, atol=2e-3)
        # Matched-precision reference (bf16 matmul inputs, f32 accumulation).
        assert jnp.allclose(p, ref_bf16, atol=2e-4, rtol=2e-2)
        # Full-f32 PyTorch-semantics reference (looser: bf16 matmul inputs).
        assert jnp.allclose(p, ref_f32, atol=1e-3, rtol=5e-2)

    print("KERNEL_OK")
</pallas_src>

<mosaic_0001>
module attributes {stable_mosaic.version = 11 : i64} {
  func.func @kernel(%arg0: i32, %arg1: i32, %arg2: memref<16x512xbf16, #tpu.memory_space<vmem>>, %arg3: memref<512x1024xbf16, #tpu.memory_space<vmem>>, %arg4: memref<1x1024xf32, #tpu.memory_space<vmem>>, %arg5: memref<16x1024xf32, #tpu.memory_space<vmem>>) attributes {dimension_semantics = [#tpu.dimension_semantics<parallel>, #tpu.dimension_semantics<arbitrary>], iteration_bounds = array<i64: 1, 1>, scalar_prefetch = 0 : i64, scratch_operands = 0 : i64, tpu.core_type = #tpu.core_type<tc>, window_params = [{transform_indices = @transform_0, window_bounds = array<i64: 16, 512>}, {transform_indices = @transform_1, window_bounds = array<i64: 512, 1024>}, {transform_indices = @transform_2, window_bounds = array<i64: 1, 1024>}, {transform_indices = @transform_3, window_bounds = array<i64: 16, 1024>}]} {
    %c0 = arith.constant 0 : index
    %c0_0 = arith.constant 0 : index
    %0 = vector.load %arg2[%c0, %c0_0] : memref<16x512xbf16, #tpu.memory_space<vmem>>, vector<16x512xbf16>
    %c0_1 = arith.constant 0 : index
    %c0_2 = arith.constant 0 : index
    %1 = vector.load %arg3[%c0_1, %c0_2] : memref<512x1024xbf16, #tpu.memory_space<vmem>>, vector<512x1024xbf16>
    %cst = arith.constant dense<0.000000e+00> : vector<16x1024xf32>
    %2 = tpu.matmul %0, %1, %cst {dimension_numbers = #tpu.dot_dimension_numbers<[1], [0], [0], [1], [0, 0, 1, 1], [], []>} : vector<16x512xbf16>, vector<512x1024xbf16>, vector<16x1024xf32> -> vector<16x1024xf32>
    %c0_3 = arith.constant 0 : index
    %c0_4 = arith.constant 0 : index
    %3 = vector.load %arg4[%c0_3, %c0_4] : memref<1x1024xf32, #tpu.memory_space<vmem>>, vector<1x1024xf32>
    %4 = vector.broadcast %3 : vector<1x1024xf32> to vector<16x1024xf32>
    %5 = arith.addf %2, %4 : vector<16x1024xf32>
    %cst_5 = arith.constant dense<0xFF800000> : vector<16xf32>
    %6 = vector.multi_reduction <maximumf>, %5, %cst_5 [1] : vector<16x1024xf32> to vector<16xf32>
    %7 = vector.shape_cast %6 : vector<16xf32> to vector<16x1xf32>
    %8 = vector.broadcast %7 : vector<16x1xf32> to vector<16x1024xf32>
    %9 = arith.subf %5, %8 : vector<16x1024xf32>
    %10 = math.exp %9 : vector<16x1024xf32>
    %cst_6 = arith.constant dense<0.000000e+00> : vector<16xf32>
    %11 = vector.multi_reduction <add>, %10, %cst_6 [1] : vector<16x1024xf32> to vector<16xf32>
    %12 = vector.shape_cast %11 : vector<16xf32> to vector<16x1xf32>
    %cst_7 = arith.constant 1.000000e+00 : f32
    %13 = vector.broadcast %cst_7 : f32 to vector<16x1xf32>
    %14 = arith.divf %13, %12 : vector<16x1xf32>
    %15 = vector.broadcast %14 : vector<16x1xf32> to vector<16x1024xf32>
    %16 = arith.mulf %10, %15 : vector<16x1024xf32>
    %c0_8 = arith.constant 0 : index
    %c0_9 = arith.constant 0 : index
    %17 = vector.load %arg5[%c0_8, %c0_9] : memref<16x1024xf32, #tpu.memory_space<vmem>>, vector<16x1024xf32>
    tpu.vector_store %arg5[%c0_8, %c0_9], %16 {strides = array<i32>} : memref<16x1024xf32, #tpu.memory_space<vmem>>, vector<16x1024xf32>,
    return
  }
  func.func @transform_0(%arg0: i32, %arg1: i32) -> (i32, i32) {
    %c0_i32 = arith.constant 0 : i32
    %c0_i32_0 = arith.constant 0 : i32
    return %arg0, %c0_i32 : i32, i32
  }
  func.func @transform_1(%arg0: i32, %arg1: i32) -> (i32, i32) {
    %c0_i32 = arith.constant 0 : i32
    %c0_i32_0 = arith.constant 0 : i32
    return %c0_i32, %arg1 : i32, i32
  }
  func.func @transform_2(%arg0: i32, %arg1: i32) -> (i32, i32) {
    %c0_i32 = arith.constant 0 : i32
    %c0_i32_0 = arith.constant 0 : i32
    return %c0_i32, %arg1 : i32, i32
  }
  func.func @transform_3(%arg0: i32, %arg1: i32) -> (i32, i32) {
    %c0_i32 = arith.constant 0 : i32
    %c0_i32_0 = arith.constant 0 : i32
    return %arg0, %c0_i32 : i32, i32
  }
}

</mosaic_0001>

<bundles_post_ra>
// kernel: tpu_custom_call.1
= control target key start
LH: loop header
LB: loop body
LE: loop exit
PB: predicated region body
PF: predicated region fallthrough
CT: control target
= control target key end

     0   :  { %8 = vsyncpa [#allocation3], 0  ;;  %s2628_s0 = inlined_call_operand.hbm [shape: bf16[16,512], index: 0, kind: input, shape index: {}]   ;;  %s2629_s1 = inlined_call_operand.hbm [shape: bf16[512,1024], index: 1, kind: input, shape index: {}]   ;;  %s2630_s2 = inlined_call_operand.hbm [shape: f32[1,1024], index: 2, kind: input, shape index: {}]   ;;  %s2631_s3 = inlined_call_operand.hbm [shape: f32[16,1024], index: 3, kind: output, shape index: {}]  }
   0x1   :  { %9 = vsyncpa [#allocation6], 0 }
   0x2   :  { %10 = vsyncpa [#allocation4], 0  ;;  %s2540_s12 = smov [#allocation5]  }
   0x3   :  { %s28_s13 = sshll.u32 %s2540_s12, 4  ;;  %s29_s13 = int_to_ptr.vmem [resolvable:$true] %s28_s13 }
   0x4   :  { %s2462_s14 = scalar_lea.vmem %s29_s13, 32768  ;;  %p2467_p1 = scmp.lt.s32.totalorder %s29_s13, %s29_s13 }
   0x5   :  { %p2463_p0 = scmp.ne.s32.totalorder %s29_s13, %s2462_s14  ;;  %p2468_p2 = scmp.lt.s32.totalorder %s2462_s14, %s2462_s14 }
   0x7   :  { %p2469_p3 = por %p2468_p2, %p2467_p1 }
   0x9   :  { %p2470_p4 = pnand %p2469_p3, %p2463_p0 }
   0xb   :  { %2473 = shalt.err (!%p2470_p4)
}
   0xc   :  { %s2541_s15 = smov 512   ;;  %s2542_s16 = smov 32  }
   0xd   :  { %34 = dma.hbm_to_vmem [thread:$0]  %s2629_s1, 32768, %s29_s13, [#allocation6], %s2541_s15, %s2541_s15, %s2542_s16  }
   0xe   :  { %s2543_s19 = smov [#allocation2]  }
   0xf   :  { %s16_s20 = sshll.u32 %s2543_s19, 4  ;;  %s17_s20 = int_to_ptr.vmem [resolvable:$true] %s16_s20 }
  0x10   :  { %s2482_s21 = scalar_lea.vmem %s17_s20, 512  ;;  %p2487_p6 = scmp.lt.s32.totalorder %s17_s20, %s17_s20 }
  0x11   :  { %p2483_p5 = scmp.ne.s32.totalorder %s17_s20, %s2482_s21  ;;  %p2488_p7 = scmp.lt.s32.totalorder %s2482_s21, %s2482_s21 }
  0x13   :  { %p2489_p8 = por %p2488_p7, %p2487_p6 }
  0x15   :  { %p2490_p9 = pnand %p2489_p8, %p2483_p5 }
  0x17   :  { %2493 = shalt.err (!%p2490_p9)
}
  0x18   :  { %s2544_s22 = smov 256   ;;  %s2545_s23 = smov 16  }
  0x19   :  { %22 = dma.hbm_to_vmem [thread:$0]  %s2628_s0, 512, %s17_s20, [#allocation3], %s2544_s22, %s2544_s22, %s2545_s23  }
  0x1a   :  { %s2546_s26 = smov [#allocation7]  }
  0x1b   :  { %s41_s27 = sshll.u32 %s2546_s26, 4  ;;  %s42_s27 = int_to_ptr.vmem [resolvable:$true] %s41_s27 }
  0x1c   :  { %s2502_s1 = scalar_lea.vmem %s42_s27, 128  ;;  %p2507_p11 = scmp.lt.s32.totalorder %s42_s27, %s42_s27 }
  0x1d   :  { %p2503_p10 = scmp.ne.s32.totalorder %s42_s27, %s2502_s1  ;;  %p2508_p12 = scmp.lt.s32.totalorder %s2502_s1, %s2502_s1 }
  0x1f   :  { %p2509_p13 = por %p2508_p12, %p2507_p11 }
  0x21   :  { %p2510_p0 = pnand %p2509_p13, %p2503_p10 }
  0x23   :  { %2513 = shalt.err (!%p2510_p0)
}
  0x24   :  { %44 = dma.hbm_to_vmem [thread:$0]  %s2630_s2, 128, %s42_s27, [#allocation6]  }
  0x25   :  { %2534 = dma.done.wait [#allocation3], 512  }
  0x26   :  { %2535 = vsyncadd [#allocation3], 4294966784 }
  0x27   :  { %2536 = dma.done.wait [#allocation6], 32896  }
  0x28   :  { %2537 = vsyncadd [#allocation6], 4294934400  ;;  %v114_v0 = vld [vmem:[#allocation5 + $0x1c0] sm:$0xff]  ;;  %v2581_v59 = vld [vmem:[#allocation2 + $0xc] ss:$16 sps:$4 sm:$0xff]   ;;  %s2547_s0 = smov [#allocation8]  }
  0x29   :  { %v118_v1 = vld [vmem:[#allocation5 + $0x1e0] sm:$0xff]  ;;  %1731 = vmatprep.mubr.bf16.mxu1 %v2581_v59  ;;  %s2125_s2 = sshll.u32 %s2547_s0, 4  ;;  %s2126_s2 = int_to_ptr.vmem [resolvable:$true] %s2125_s2 }
  0x2a   :  { %v242_v2 = vld [vmem:[#allocation5 + $0x5c0] sm:$0xff]  ;;  %v2199_v3 = vcombine.high %v114_v0, %v118_v1  ;;  %v2198_v5 = vcombine.low %v114_v0, %v118_v1  ;;  %s2514_s30 = scalar_lea.vmem %s2126_s2, 2048  ;;  %p2519_p2 = scmp.lt.s32.totalorder %s2126_s2, %s2126_s2 }
  0x2b   :  { %v246_v4 = vld [vmem:[#allocation5 + $0x5e0] sm:$0xff]  ;;  %p2515_p1 = scmp.ne.s32.totalorder %s2126_s2, %s2514_s30  ;;  %p2520_p3 = scmp.lt.s32.totalorder %s2514_s30, %s2514_s30 }
  0x2c   :  { %v106_v6 = vld [vmem:[#allocation5 + $0x180] sm:$0xff]  ;;  %v2327_v8 = vcombine.high %v242_v2, %v246_v4  ;;  %v2326_v9 = vcombine.low %v242_v2, %v246_v4  ;;  %1656 = vmatprep.subr.bf16.mxu0 %v2199_v3 }
  0x2d   :  { %v110_v7 = vld [vmem:[#allocation5 + $0x1a0] sm:$0xff]  ;;  %1657 = vmatpush1.bf16.msra.mxu0 %v2198_v5  ;;  %p2521_p4 = por %p2520_p3, %p2519_p2 }
  0x2e   :  { %v2191_v10 = vcombine.high %v106_v6, %v110_v7  ;;  %v234_v11 = vld [vmem:[#allocation5 + $0x580] sm:$0xff]  ;;  %1699 = vmatprep.subr.bf16.mxu1 %v2327_v8  ;;  %v2190_v18 = vcombine.low %v106_v6, %v110_v7 }
  0x2f   :  { %v238_v12 = vld [vmem:[#allocation5 + $0x5a0] sm:$0xff]  ;;  %1700 = vmatpush1.bf16.msra.mxu1 %v2326_v9  ;;  %p2522_p5 = pnand %p2521_p4, %p2515_p1 }
  0x30   :  { %v98_v13 = vld [vmem:[#allocation5 + $0x140] sm:$0xff]  ;;  %v2319_v14 = vcombine.high %v234_v11, %v238_v12  ;;  %1658 = vmatprep.subr.bf16.mxu0 %v2191_v10  ;;  %v2318_v19 = vcombine.low %v234_v11, %v238_v12 }
  0x31   :  { %v102_v15 = vld [vmem:[#allocation5 + $0x160] sm:$0xff]  ;;  %1659 = vmatpush1.bf16.msra.mxu0 %v2190_v18 }
  0x32   :  { %v226_v16 = vld [vmem:[#allocation5 + $0x540] sm:$0xff]  ;;  %v2183_v20 = vcombine.high %v98_v13, %v102_v15  ;;  %1701 = vmatprep.subr.bf16.mxu1 %v2319_v14  ;;  %v2182_v26 = vcombine.low %v98_v13, %v102_v15 }
  0x33   :  { %v230_v17 = vld [vmem:[#allocation5 + $0x560] sm:$0xff]  ;;  %1702 = vmatpush1.bf16.msra.mxu1 %v2318_v19 }
  0x34   :  { %v2311_v21 = vcombine.high %v226_v16, %v230_v17  ;;  %v90_v22 = vld [vmem:[#allocation5 + $0x100] sm:$0xff]  ;;  %1660 = vmatprep.subr.bf16.mxu0 %v2183_v20  ;;  %v2310_v27 = vcombine.low %v226_v16, %v230_v17 }
  0x35   :  { %v94_v23 = vld [vmem:[#allocation5 + $0x120] sm:$0xff]  ;;  %1661 = vmatpush1.bf16.msra.mxu0 %v2182_v26 }
  0x36   :  { %v218_v24 = vld [vmem:[#allocation5 + $0x500] sm:$0xff]  ;;  %v2175_v28 = vcombine.high %v90_v22, %v94_v23  ;;  %1703 = vmatprep.subr.bf16.mxu1 %v2311_v21  ;;  %v2174_v34 = vcombine.low %v90_v22, %v94_v23 }
  0x37   :  { %v222_v25 = vld [vmem:[#allocation5 + $0x520] sm:$0xff]  ;;  %1704 = vmatpush1.bf16.msra.mxu1 %v2310_v27 }
  0x38   :  { %v2303_v29 = vcombine.high %v218_v24, %v222_v25  ;;  %v82_v30 = vld [vmem:[#allocation5 + $0xc0] sm:$0xff]  ;;  %1662 = vmatprep.subr.bf16.mxu0 %v2175_v28  ;;  %v2302_v35 = vcombine.low %v218_v24, %v222_v25 }
  0x39   :  { %v86_v31 = vld [vmem:[#allocation5 + $0xe0] sm:$0xff]  ;;  %1663 = vmatpush1.bf16.msra.mxu0 %v2174_v34 }
  0x3a   :  { %v210_v32 = vld [vmem:[#allocation5 + $0x4c0] sm:$0xff]  ;;  %v2167_v36 = vcombine.high %v82_v30, %v86_v31  ;;  %1705 = vmatprep.subr.bf16.mxu1 %v2303_v29  ;;  %v2166_v42 = vcombine.low %v82_v30, %v86_v31 }
  0x3b   :  { %v214_v33 = vld [vmem:[#allocation5 + $0x4e0] sm:$0xff]  ;;  %1706 = vmatpush1.bf16.msra.mxu1 %v2302_v35 }
  0x3c   :  { %v2295_v37 = vcombine.high %v210_v32, %v214_v33  ;;  %v74_v38 = vld [vmem:[#allocation5 + $0x80] sm:$0xff]  ;;  %1664 = vmatprep.subr.bf16.mxu0 %v2167_v36  ;;  %v2294_v43 = vcombine.low %v210_v32, %v214_v33 }
  0x3d   :  { %v78_v39 = vld [vmem:[#allocation5 + $0xa0] sm:$0xff]  ;;  %1665 = vmatpush1.bf16.msra.mxu0 %v2166_v42 }
  0x3e   :  { %v202_v40 = vld [vmem:[#allocation5 + $0x480] sm:$0xff]  ;;  %v2159_v44 = vcombine.high %v74_v38, %v78_v39  ;;  %1707 = vmatprep.subr.bf16.mxu1 %v2295_v37  ;;  %v2158_v50 = vcombine.low %v74_v38, %v78_v39 }
  0x3f   :  { %v206_v41 = vld [vmem:[#allocation5 + $0x4a0] sm:$0xff]  ;;  %1708 = vmatpush1.bf16.msra.mxu1 %v2294_v43 }
  0x40   :  { %v2287_v45 = vcombine.high %v202_v40, %v206_v41  ;;  %v66_v46 = vld [vmem:[#allocation5 + $0x40] sm:$0xff]  ;;  %1666 = vmatprep.subr.bf16.mxu0 %v2159_v44  ;;  %v2286_v52 = vcombine.low %v202_v40, %v206_v41 }
  0x41   :  { %v70_v47 = vld [vmem:[#allocation5 + $0x60] sm:$0xff]  ;;  %1667 = vmatpush1.bf16.msra.mxu0 %v2158_v50 }
  0x42   :  { %v194_v48 = vld [vmem:[#allocation5 + $0x440] sm:$0xff]  ;;  %v2151_v53 = vcombine.high %v66_v46, %v70_v47  ;;  %1709 = vmatprep.subr.bf16.mxu1 %v2287_v45  ;;  %v2150_v60 = vcombine.low %v66_v46, %v70_v47 }
  0x43   :  { %v198_v49 = vld [vmem:[#allocation5 + $0x460] sm:$0xff]  ;;  %1710 = vmatpush1.bf16.msra.mxu1 %v2286_v52 }
  0x44   :  { %v58_v51 = vld [vmem:[#allocation5] sm:$0xff]  ;;  %v2279_v55 = vcombine.high %v194_v48, %v198_v49  ;;  %1668 = vmatprep.subr.bf16.mxu0 %v2151_v53  ;;  %v2278_v61 = vcombine.low %v194_v48, %v198_v49 }
  0x45   :  { %v62_v54 = vld [vmem:[#allocation5 + $0x20] sm:$0xff]  ;;  %1669 = vmatpush1.bf16.msra.mxu0 %v2150_v60 }
  0x46   :  { %v2579_v56 = vld [vmem:[#allocation2 + $0x4] ss:$16 sps:$4 sm:$0xff]   ;;  %v2143_v62 = vcombine.high %v58_v51, %v62_v54  ;;  %1711 = vmatprep.subr.bf16.mxu1 %v2279_v55  ;;  %v2142_v4 = vcombine.low %v58_v51, %v62_v54 }
  0x47   :  { %v186_v57 = vld [vmem:[#allocation5 + $0x400] sm:$0xff]  ;;  %1688 = vmatprep.mubr.bf16.mxu0 %v2579_v56  ;;  %1712 = vmatpush1.bf16.msra.mxu1 %v2278_v61 }
  0x48   :  { %v190_v58 = vld [vmem:[#allocation5 + $0x420] sm:$0xff]  ;;  %1670 = vmatprep.subr.bf16.mxu0 %v2143_v62 }
  0x49   :  { %v2271_v63 = vcombine.high %v186_v57, %v190_v58  ;;  %v178_v0 = vld [vmem:[#allocation5 + $0x3c0] sm:$0xff]  ;;  %v2270_v5 = vcombine.low %v186_v57, %v190_v58  ;;  %1671 = vmatpush1.bf16.msra.mxu0 %v2142_v4  ;;  %v243_v4 = vld [vmem:[#allocation5 + $0x5c8] sm:$0xff] }
  0x4a   :  { %v182_v1 = vld [vmem:[#allocation5 + $0x3e0] sm:$0xff] }
  0x4b   :  { %v306_v2 = vld [vmem:[#allocation5 + $0x7c0] sm:$0xff]  ;;  %v2263_v6 = vcombine.high %v178_v0, %v182_v1  ;;  %1713 = vmatprep.subr.bf16.mxu1 %v2271_v63  ;;  %v2262_v12 = vcombine.low %v178_v0, %v182_v1 }
  0x4c   :  { %v310_v3 = vld [vmem:[#allocation5 + $0x7e0] sm:$0xff]  ;;  %1714 = vmatpush1.bf16.msra.mxu1 %v2270_v5  ;;  %v247_v5 = vld [vmem:[#allocation5 + $0x5e8] sm:$0xff] }
  0x4d   :  { %v2391_v7 = vcombine.high %v306_v2, %v310_v3  ;;  %v170_v8 = vld [vmem:[#allocation5 + $0x380] sm:$0xff]  ;;  %1672 = vmatprep.subr.bf16.mxu0 %v2263_v6  ;;  %v2390_v13 = vcombine.low %v306_v2, %v310_v3  ;;  %v115_v2 = vld [vmem:[#allocation5 + $0x1c8] sm:$0xff] }
  0x4e   :  { %v174_v9 = vld [vmem:[#allocation5 + $0x3a0] sm:$0xff]  ;;  %1673 = vmatpush2.bf16.msra.mxu0 %v2262_v12  ;;  %v119_v3 = vld [vmem:[#allocation5 + $0x1e8] sm:$0xff] }
  0x4f   :  { %v298_v10 = vld [vmem:[#allocation5 + $0x780] sm:$0xff]  ;;  %v2255_v14 = vcombine.high %v170_v8, %v174_v9  ;;  %1715 = vmatprep.subr.bf16.mxu1 %v2391_v7  ;;  %v2254_v20 = vcombine.low %v170_v8, %v174_v9  ;;  %v2201_v8 = vcombine.high %v115_v2, %v119_v3  ;;  %v2329_v9 = vcombine.high %v243_v4, %v247_v5 }
  0x50   :  { %v302_v11 = vld [vmem:[#allocation5 + $0x7a0] sm:$0xff]  ;;  %1716 = vmatpush2.bf16.msra.mxu1 %v2390_v13  ;;  %v235_v13 = vld [vmem:[#allocation5 + $0x588] sm:$0xff] }
  0x51   :  { %v2383_v15 = vcombine.high %v298_v10, %v302_v11  ;;  %v162_v16 = vld [vmem:[#allocation5 + $0x340] sm:$0xff]  ;;  %1674 = vmatprep.subr.bf16.mxu0 %v2255_v14  ;;  %v2382_v21 = vcombine.low %v298_v10, %v302_v11  ;;  %v107_v10 = vld [vmem:[#allocation5 + $0x188] sm:$0xff] }
  0x52   :  { %v166_v17 = vld [vmem:[#allocation5 + $0x360] sm:$0xff]  ;;  %1675 = vmatpush2.bf16.msra.mxu0 %v2254_v20  ;;  %v111_v11 = vld [vmem:[#allocation5 + $0x1a8] sm:$0xff] }
  0x53   :  { %v290_v18 = vld [vmem:[#allocation5 + $0x740] sm:$0xff]  ;;  %v2247_v22 = vcombine.high %v162_v16, %v166_v17  ;;  %1717 = vmatprep.subr.bf16.mxu1 %v2383_v15  ;;  %v2246_v28 = vcombine.low %v162_v16, %v166_v17  ;;  %v239_v14 = vld [vmem:[#allocation5 + $0x5a8] sm:$0xff]  ;;  %v2200_v16 = vcombine.low %v115_v2, %v119_v3  ;;  %v2328_v17 = vcombine.low %v243_v4, %v247_v5 }
  0x54   :  { %v294_v19 = vld [vmem:[#allocation5 + $0x760] sm:$0xff]  ;;  %1718 = vmatpush2.bf16.msra.mxu1 %v2382_v21  ;;  %v2587_v15 = vld [vmem:[#allocation2 + $0x8] ss:$16 sps:$4 sm:$0xff]  }
  0x55   :  { %v2375_v23 = vcombine.high %v290_v18, %v294_v19  ;;  %v154_v24 = vld [vmem:[#allocation5 + $0x300] sm:$0xff]  ;;  %1676 = vmatprep.subr.bf16.mxu0 %v2247_v22  ;;  %v2374_v29 = vcombine.low %v290_v18, %v294_v19  ;;  %v2193_v18 = vcombine.high %v107_v10, %v111_v11  ;;  %v2321_v19 = vcombine.high %v235_v13, %v239_v14  ;;  %v99_v20 = vld [vmem:[#allocation5 + $0x148] sm:$0xff] }
  0x56   :  { %v158_v25 = vld [vmem:[#allocation5 + $0x320] sm:$0xff]  ;;  %1677 = vmatpush2.bf16.msra.mxu0 %v2246_v28  ;;  %v103_v21 = vld [vmem:[#allocation5 + $0x168] sm:$0xff] }
  0x57   :  { %v282_v26 = vld [vmem:[#allocation5 + $0x700] sm:$0xff]  ;;  %v2239_v30 = vcombine.high %v154_v24, %v158_v25  ;;  %1719 = vmatprep.subr.bf16.mxu1 %v2375_v23  ;;  %v2238_v36 = vcombine.low %v154_v24, %v158_v25  ;;  %v227_v22 = vld [vmem:[#allocation5 + $0x548] sm:$0xff]  ;;  %v2192_v24 = vcombine.low %v107_v10, %v111_v11  ;;  %v2320_v25 = vcombine.low %v235_v13, %v239_v14 }
  0x58   :  { %v286_v27 = vld [vmem:[#allocation5 + $0x720] sm:$0xff]  ;;  %1720 = vmatpush2.bf16.msra.mxu1 %v2374_v29  ;;  %v231_v23 = vld [vmem:[#allocation5 + $0x568] sm:$0xff] }
  0x59   :  { %v2367_v31 = vcombine.high %v282_v26, %v286_v27  ;;  %v146_v32 = vld [vmem:[#allocation5 + $0x2c0] sm:$0xff]  ;;  %1678 = vmatprep.subr.bf16.mxu0 %v2239_v30  ;;  %v2366_v37 = vcombine.low %v282_v26, %v286_v27  ;;  %v2185_v26 = vcombine.high %v99_v20, %v103_v21  ;;  %v2313_v27 = vcombine.high %v227_v22, %v231_v23  ;;  %v91_v28 = vld [vmem:[#allocation5 + $0x108] sm:$0xff] }
  0x5a   :  { %v150_v33 = vld [vmem:[#allocation5 + $0x2e0] sm:$0xff]  ;;  %1679 = vmatpush2.bf16.msra.mxu0 %v2238_v36  ;;  %v95_v29 = vld [vmem:[#allocation5 + $0x128] sm:$0xff] }
  0x5b   :  { %v274_v34 = vld [vmem:[#allocation5 + $0x6c0] sm:$0xff]  ;;  %v2231_v38 = vcombine.high %v146_v32, %v150_v33  ;;  %1721 = vmatprep.subr.bf16.mxu1 %v2367_v31  ;;  %v2230_v44 = vcombine.low %v146_v32, %v150_v33  ;;  %v219_v30 = vld [vmem:[#allocation5 + $0x508] sm:$0xff]  ;;  %v2184_v32 = vcombine.low %v99_v20, %v103_v21  ;;  %v2312_v33 = vcombine.low %v227_v22, %v231_v23 }
  0x5c   :  { %v278_v35 = vld [vmem:[#allocation5 + $0x6e0] sm:$0xff]  ;;  %1722 = vmatpush2.bf16.msra.mxu1 %v2366_v37  ;;  %v223_v31 = vld [vmem:[#allocation5 + $0x528] sm:$0xff] }
  0x5d   :  { %v2359_v39 = vcombine.high %v274_v34, %v278_v35  ;;  %v138_v40 = vld [vmem:[#allocation5 + $0x280] sm:$0xff]  ;;  %1680 = vmatprep.subr.bf16.mxu0 %v2231_v38  ;;  %v2358_v45 = vcombine.low %v274_v34, %v278_v35  ;;  %v2177_v34 = vcombine.high %v91_v28, %v95_v29  ;;  %v2305_v35 = vcombine.high %v219_v30, %v223_v31  ;;  %v83_v36 = vld [vmem:[#allocation5 + $0xc8] sm:$0xff] }
  0x5e   :  { %v142_v41 = vld [vmem:[#allocation5 + $0x2a0] sm:$0xff]  ;;  %1681 = vmatpush2.bf16.msra.mxu0 %v2230_v44  ;;  %v87_v37 = vld [vmem:[#allocation5 + $0xe8] sm:$0xff] }
  0x5f   :  { %v266_v42 = vld [vmem:[#allocation5 + $0x680] sm:$0xff]  ;;  %v2223_v46 = vcombine.high %v138_v40, %v142_v41  ;;  %1723 = vmatprep.subr.bf16.mxu1 %v2359_v39  ;;  %v2222_v52 = vcombine.low %v138_v40, %v142_v41  ;;  %v211_v38 = vld [vmem:[#allocation5 + $0x4c8] sm:$0xff]  ;;  %v2176_v40 = vcombine.low %v91_v28, %v95_v29  ;;  %v2304_v41 = vcombine.low %v219_v30, %v223_v31 }
  0x60   :  { %v270_v43 = vld [vmem:[#allocation5 + $0x6a0] sm:$0xff]  ;;  %1724 = vmatpush2.bf16.msra.mxu1 %v2358_v45  ;;  %v215_v39 = vld [vmem:[#allocation5 + $0x4e8] sm:$0xff] }
  0x61   :  { %v2351_v47 = vcombine.high %v266_v42, %v270_v43  ;;  %v130_v48 = vld [vmem:[#allocation5 + $0x240] sm:$0xff]  ;;  %1682 = vmatprep.subr.bf16.mxu0 %v2223_v46  ;;  %v2350_v53 = vcombine.low %v266_v42, %v270_v43  ;;  %v2169_v42 = vcombine.high %v83_v36, %v87_v37  ;;  %v2297_v43 = vcombine.high %v211_v38, %v215_v39  ;;  %v75_v44 = vld [vmem:[#allocation5 + $0x88] sm:$0xff] }
  0x62   :  { %v134_v49 = vld [vmem:[#allocation5 + $0x260] sm:$0xff]  ;;  %1683 = vmatpush2.bf16.msra.mxu0 %v2222_v52  ;;  %v79_v45 = vld [vmem:[#allocation5 + $0xa8] sm:$0xff] }
  0x63   :  { %v258_v50 = vld [vmem:[#allocation5 + $0x640] sm:$0xff]  ;;  %v2215_v54 = vcombine.high %v130_v48, %v134_v49  ;;  %1725 = vmatprep.subr.bf16.mxu1 %v2351_v47  ;;  %v2214_v62 = vcombine.low %v130_v48, %v134_v49  ;;  %v203_v46 = vld [vmem:[#allocation5 + $0x488] sm:$0xff]  ;;  %v2168_v48 = vcombine.low %v83_v36, %v87_v37  ;;  %v2296_v49 = vcombine.low %v211_v38, %v215_v39 }
  0x64   :  { %v262_v51 = vld [vmem:[#allocation5 + $0x660] sm:$0xff]  ;;  %1726 = vmatpush2.bf16.msra.mxu1 %v2350_v53  ;;  %v207_v47 = vld [vmem:[#allocation5 + $0x4a8] sm:$0xff] }
  0x65   :  { %v2343_v55 = vcombine.high %v258_v50, %v262_v51  ;;  %v122_v57 = vld [vmem:[#allocation5 + $0x200] sm:$0xff]  ;;  %1684 = vmatprep.subr.bf16.mxu0 %v2215_v54  ;;  %v2342_v63 = vcombine.low %v258_v50, %v262_v51  ;;  %v2161_v50 = vcombine.high %v75_v44, %v79_v45  ;;  %v2289_v51 = vcombine.high %v203_v46, %v207_v47  ;;  %v67_v52 = vld [vmem:[#allocation5 + $0x48] sm:$0xff] }
  0x66   :  { %v126_v58 = vld [vmem:[#allocation5 + $0x220] sm:$0xff]  ;;  %1685 = vmatpush2.bf16.msra.mxu0 %v2214_v62  ;;  %v71_v53 = vld [vmem:[#allocation5 + $0x68] sm:$0xff] }
  0x67   :  { %v250_v60 = vld [vmem:[#allocation5 + $0x600] sm:$0xff]  ;;  %v2207_v0 = vcombine.high %v122_v57, %v126_v58  ;;  %1727 = vmatprep.subr.bf16.mxu1 %v2343_v55  ;;  %v2206_v6 = vcombine.low %v122_v57, %v126_v58  ;;  %v195_v54 = vld [vmem:[#allocation5 + $0x448] sm:$0xff]  ;;  %v2160_v57 = vcombine.low %v75_v44, %v79_v45  ;;  %v2288_v58 = vcombine.low %v203_v46, %v207_v47 }
  0x68   :  { %v254_v61 = vld [vmem:[#allocation5 + $0x620] sm:$0xff]  ;;  %1728 = vmatpush2.bf16.msra.mxu1 %v2342_v63  ;;  %v199_v55 = vld [vmem:[#allocation5 + $0x468] sm:$0xff]  ;;  %v2152_v2 = vcombine.low %v67_v52, %v71_v53 }
  0x69   :  { %v2335_v1 = vcombine.high %v250_v60, %v254_v61  ;;  %1686 = vmatprep.subr.bf16.mxu0 %v2207_v0  ;;  %v2334_v7 = vcombine.low %v250_v60, %v254_v61  ;;  %v2585_v12 = vld [vmem:[#allocation2] ss:$16 sps:$4 sm:$0xff]   ;;  %v2153_v60 = vcombine.high %v67_v52, %v71_v53  ;;  %v2281_v61 = vcombine.high %v195_v54, %v199_v55  ;;  %v59_v62 = vld [vmem:[#allocation5 + $0x8] sm:$0xff] }
  0x6a   :  { %1687 = vmatpush2.bf16.msra.mxu0 %v2206_v6  ;;  %v63_v63 = vld [vmem:[#allocation5 + $0x28] sm:$0xff]  ;;  %v2280_v3 = vcombine.low %v195_v54, %v199_v55 }
  0x6b   :  { %1729 = vmatprep.subr.bf16.mxu1 %v2335_v1  ;;  %1742 = vmatprep.subr.bf16.mxu0 %v2201_v8  ;;  %v187_v0 = vld [vmem:[#allocation5 + $0x408] sm:$0xff]  ;;  %v2145_v4 = vcombine.high %v59_v62, %v63_v63  ;;  %v2144_v10 = vcombine.low %v59_v62, %v63_v63 }
  0x6c   :  { %1730 = vmatpush2.bf16.msra.mxu1 %v2334_v7  ;;  %v191_v1 = vld [vmem:[#allocation5 + $0x428] sm:$0xff] }
  0x6d   :  { %1785 = vmatprep.subr.bf16.mxu1 %v2329_v9  ;;  %1689 = vmatmul.mubr.bf16.vlgmr.msra.gmra.mxu0 %v2585_v12  ;;  %v2273_v5 = vcombine.high %v187_v0, %v191_v1  ;;  %v179_v6 = vld [vmem:[#allocation5 + $0x3c8] sm:$0xff]  ;;  %v2272_v11 = vcombine.low %v187_v0, %v191_v1 }
  0x6e   :  { %1743 = vmatpush1.bf16.msra.mxu0 %v2200_v16  ;;  %1774 = vmatprep.mubr.bf16.mxu0 %v2579_v56  ;;  %v183_v7 = vld [vmem:[#allocation5 + $0x3e8] sm:$0xff] }
  0x6f   :  { %1732 = vmatmul.mubr.bf16.vlgmr.msra.gmra.mxu1 %v2587_v15  ;;  %1744 = vmatprep.subr.bf16.mxu0 %v2193_v18  ;;  %v307_v8 = vld [vmem:[#allocation5 + $0x7c8] sm:$0xff]  ;;  %v2265_v13 = vcombine.high %v179_v6, %v183_v7  ;;  %v2264_v20 = vcombine.low %v179_v6, %v183_v7 }
  0x70   :  { %1786 = vmatpush1.bf16.msra.mxu1 %v2328_v17  ;;  %1817 = vmatprep.mubr.bf16.mxu1 %v2581_v59  ;;  %v311_v9 = vld [vmem:[#allocation5 + $0x7e8] sm:$0xff] }
  0x71   :  { %1787 = vmatprep.subr.bf16.mxu1 %v2321_v19  ;;  %v2393_v14 = vcombine.high %v307_v8, %v311_v9  ;;  %v171_v16 = vld [vmem:[#allocation5 + $0x388] sm:$0xff]  ;;  %v2392_v21 = vcombine.low %v307_v8, %v311_v9 }
  0x72   :  { %1745 = vmatpush1.bf16.msra.mxu0 %v2192_v24  ;;  %v175_v17 = vld [vmem:[#allocation5 + $0x3a8] sm:$0xff] }
  0x73   :  { %1746 = vmatprep.subr.bf16.mxu0 %v2185_v26  ;;  %v299_v18 = vld [vmem:[#allocation5 + $0x788] sm:$0xff]  ;;  %v2257_v22 = vcombine.high %v171_v16, %v175_v17  ;;  %v2256_v28 = vcombine.low %v171_v16, %v175_v17 }
  0x74   :  { %1788 = vmatpush1.bf16.msra.mxu1 %v2320_v25  ;;  %v303_v19 = vld [vmem:[#allocation5 + $0x7a8] sm:$0xff] }
  0x75   :  { %1789 = vmatprep.subr.bf16.mxu1 %v2313_v27  ;;  %v2385_v23 = vcombine.high %v299_v18, %v303_v19  ;;  %v163_v24 = vld [vmem:[#allocation5 + $0x348] sm:$0xff]  ;;  %v2384_v29 = vcombine.low %v299_v18, %v303_v19 }
  0x76   :  { %1747 = vmatpush1.bf16.msra.mxu0 %v2184_v32  ;;  %v167_v25 = vld [vmem:[#allocation5 + $0x368] sm:$0xff] }
  0x77   :  { %1748 = vmatprep.subr.bf16.mxu0 %v2177_v34  ;;  %v291_v26 = vld [vmem:[#allocation5 + $0x748] sm:$0xff]  ;;  %v2249_v30 = vcombine.high %v163_v24, %v167_v25  ;;  %v2248_v36 = vcombine.low %v163_v24, %v167_v25 }
  0x78   :  { %1790 = vmatpush1.bf16.msra.mxu1 %v2312_v33  ;;  %v295_v27 = vld [vmem:[#allocation5 + $0x768] sm:$0xff] }
  0x79   :  { %1791 = vmatprep.subr.bf16.mxu1 %v2305_v35  ;;  %v2377_v31 = vcombine.high %v291_v26, %v295_v27  ;;  %v155_v32 = vld [vmem:[#allocation5 + $0x308] sm:$0xff]  ;;  %v2376_v37 = vcombine.low %v291_v26, %v295_v27 }
  0x7a   :  { %1749 = vmatpush1.bf16.msra.mxu0 %v2176_v40  ;;  %v159_v33 = vld [vmem:[#allocation5 + $0x328] sm:$0xff] }
  0x7b   :  { %1750 = vmatprep.subr.bf16.mxu0 %v2169_v42  ;;  %v283_v34 = vld [vmem:[#allocation5 + $0x708] sm:$0xff]  ;;  %v2241_v38 = vcombine.high %v155_v32, %v159_v33  ;;  %v2240_v44 = vcombine.low %v155_v32, %v159_v33 }
  0x7c   :  { %1792 = vmatpush1.bf16.msra.mxu1 %v2304_v41  ;;  %v287_v35 = vld [vmem:[#allocation5 + $0x728] sm:$0xff] }
  0x7d   :  { %1793 = vmatprep.subr.bf16.mxu1 %v2297_v43  ;;  %v2369_v39 = vcombine.high %v283_v34, %v287_v35  ;;  %v147_v40 = vld [vmem:[#allocation5 + $0x2c8] sm:$0xff]  ;;  %v2368_v45 = vcombine.low %v283_v34, %v287_v35 }
  0x7e   :  { %1751 = vmatpush1.bf16.msra.mxu0 %v2168_v48  ;;  %v151_v41 = vld [vmem:[#allocation5 + $0x2e8] sm:$0xff] }
  0x7f   :  { %1752 = vmatprep.subr.bf16.mxu0 %v2161_v50  ;;  %v275_v42 = vld [vmem:[#allocation5 + $0x6c8] sm:$0xff]  ;;  %v2233_v46 = vcombine.high %v147_v40, %v151_v41  ;;  %v2232_v52 = vcombine.low %v147_v40, %v151_v41 }
  0x80   :  { %1794 = vmatpush1.bf16.msra.mxu1 %v2296_v49  ;;  %v279_v43 = vld [vmem:[#allocation5 + $0x6e8] sm:$0xff] }
  0x81   :  { %1795 = vmatprep.subr.bf16.mxu1 %v2289_v51  ;;  %v2361_v47 = vcombine.high %v275_v42, %v279_v43  ;;  %v139_v48 = vld [vmem:[#allocation5 + $0x288] sm:$0xff]  ;;  %v2360_v53 = vcombine.low %v275_v42, %v279_v43 }
  0x82   :  { %1753 = vmatpush1.bf16.msra.mxu0 %v2160_v57  ;;  %v143_v49 = vld [vmem:[#allocation5 + $0x2a8] sm:$0xff] }
  0x83   :  { %1754 = vmatprep.subr.bf16.mxu0 %v2153_v60  ;;  %v267_v50 = vld [vmem:[#allocation5 + $0x688] sm:$0xff]  ;;  %v2225_v54 = vcombine.high %v139_v48, %v143_v49  ;;  %v2224_v62 = vcombine.low %v139_v48, %v143_v49 }
  0x84   :  { %1796 = vmatpush1.bf16.msra.mxu1 %v2288_v58  ;;  %v271_v51 = vld [vmem:[#allocation5 + $0x6a8] sm:$0xff] }
  0x85   :  { %1797 = vmatprep.subr.bf16.mxu1 %v2281_v61  ;;  %v2353_v55 = vcombine.high %v267_v50, %v271_v51  ;;  %v131_v57 = vld [vmem:[#allocation5 + $0x248] sm:$0xff]  ;;  %v2352_v63 = vcombine.low %v267_v50, %v271_v51  ;;  %v76_v50 = vld [vmem:[#allocation5 + $0x90] sm:$0xff] }
  0x86   :  { %1755 = vmatpush1.bf16.msra.mxu0 %v2152_v2  ;;  %v135_v58 = vld [vmem:[#allocation5 + $0x268] sm:$0xff]  ;;  %v80_v51 = vld [vmem:[#allocation5 + $0xb0] sm:$0xff] }
  0x87   :  { %1756 = vmatprep.subr.bf16.mxu0 %v2145_v4  ;;  %v259_v60 = vld [vmem:[#allocation5 + $0x648] sm:$0xff]  ;;  %v2217_v0 = vcombine.high %v131_v57, %v135_v58  ;;  %v2216_v6 = vcombine.low %v131_v57, %v135_v58  ;;  %v2163_v57 = vcombine.high %v76_v50, %v80_v51 }
  0x88   :  { %1798 = vmatpush1.bf16.msra.mxu1 %v2280_v3  ;;  %v263_v61 = vld [vmem:[#allocation5 + $0x668] sm:$0xff] }
  0x89   :  { %1799 = vmatprep.subr.bf16.mxu1 %v2273_v5  ;;  %v2345_v1 = vcombine.high %v259_v60, %v263_v61  ;;  %v123_v2 = vld [vmem:[#allocation5 + $0x208] sm:$0xff]  ;;  %v2344_v7 = vcombine.low %v259_v60, %v263_v61  ;;  %v68_v60 = vld [vmem:[#allocation5 + $0x50] sm:$0xff] }
  0x8a   :  { %1757 = vmatpush1.bf16.msra.mxu0 %v2144_v10  ;;  %v127_v3 = vld [vmem:[#allocation5 + $0x228] sm:$0xff]  ;;  %v116_v10 = vld [vmem:[#allocation5 + $0x1d0] sm:$0xff] }
  0x8b   :  { %1758 = vmatprep.subr.bf16.mxu0 %v2265_v13  ;;  %v251_v4 = vld [vmem:[#allocation5 + $0x608] sm:$0xff]  ;;  %v2209_v8 = vcombine.high %v123_v2, %v127_v3  ;;  %v244_v13 = vld [vmem:[#allocation5 + $0x5d0] sm:$0xff]  ;;  %v2208_v16 = vcombine.low %v123_v2, %v127_v3 }
  0x8c   :  { %1800 = vmatpush1.bf16.msra.mxu1 %v2272_v11  ;;  %v255_v5 = vld [vmem:[#allocation5 + $0x628] sm:$0xff]  ;;  %v120_v11 = vld [vmem:[#allocation5 + $0x1f0] sm:$0xff] }
  0x8d   :  { %1801 = vmatprep.subr.bf16.mxu1 %v2393_v14  ;;  %v2337_v9 = vcombine.high %v251_v4, %v255_v5  ;;  %v248_v14 = vld [vmem:[#allocation5 + $0x5f0] sm:$0xff]  ;;  %v2336_v17 = vcombine.low %v251_v4, %v255_v5  ;;  %v2203_v18 = vcombine.high %v116_v10, %v120_v11  ;;  %v2202_v24 = vcombine.low %v116_v10, %v120_v11 }
  0x8e   :  { %1759 = vmatpush2.bf16.msra.mxu0 %v2264_v20  ;;  %v2331_v19 = vcombine.high %v244_v13, %v248_v14  ;;  %v108_v20 = vld [vmem:[#allocation5 + $0x190] sm:$0xff]  ;;  %v2330_v25 = vcombine.low %v244_v13, %v248_v14 }
  0x8f   :  { %1760 = vmatprep.subr.bf16.mxu0 %v2257_v22  ;;  %v236_v22 = vld [vmem:[#allocation5 + $0x590] sm:$0xff] }
  0x90   :  { %1802 = vmatpush2.bf16.msra.mxu1 %v2392_v21  ;;  %v112_v21 = vld [vmem:[#allocation5 + $0x1b0] sm:$0xff] }
  0x91   :  { %1803 = vmatprep.subr.bf16.mxu1 %v2385_v23  ;;  %v240_v23 = vld [vmem:[#allocation5 + $0x5b0] sm:$0xff]  ;;  %v2195_v26 = vcombine.high %v108_v20, %v112_v21  ;;  %v2194_v32 = vcombine.low %v108_v20, %v112_v21 }
  0x92   :  { %1761 = vmatpush2.bf16.msra.mxu0 %v2256_v28  ;;  %v2323_v27 = vcombine.high %v236_v22, %v240_v23  ;;  %v100_v28 = vld [vmem:[#allocation5 + $0x150] sm:$0xff]  ;;  %v2322_v33 = vcombine.low %v236_v22, %v240_v23 }
  0x93   :  { %1762 = vmatprep.subr.bf16.mxu0 %v2249_v30  ;;  %v228_v30 = vld [vmem:[#allocation5 + $0x550] sm:$0xff] }
  0x94   :  { %1804 = vmatpush2.bf16.msra.mxu1 %v2384_v29  ;;  %v104_v29 = vld [vmem:[#allocation5 + $0x170] sm:$0xff] }
  0x95   :  { %1805 = vmatprep.subr.bf16.mxu1 %v2377_v31  ;;  %v232_v31 = vld [vmem:[#allocation5 + $0x570] sm:$0xff]  ;;  %v2187_v34 = vcombine.high %v100_v28, %v104_v29  ;;  %v2186_v40 = vcombine.low %v100_v28, %v104_v29 }
  0x96   :  { %1763 = vmatpush2.bf16.msra.mxu0 %v2248_v36  ;;  %v2315_v35 = vcombine.high %v228_v30, %v232_v31  ;;  %v92_v36 = vld [vmem:[#allocation5 + $0x110] sm:$0xff]  ;;  %v2314_v41 = vcombine.low %v228_v30, %v232_v31 }
  0x97   :  { %1764 = vmatprep.subr.bf16.mxu0 %v2241_v38  ;;  %v220_v38 = vld [vmem:[#allocation5 + $0x510] sm:$0xff] }
  0x98   :  { %1806 = vmatpush2.bf16.msra.mxu1 %v2376_v37  ;;  %v96_v37 = vld [vmem:[#allocation5 + $0x130] sm:$0xff] }
  0x99   :  { %1807 = vmatprep.subr.bf16.mxu1 %v2369_v39  ;;  %v224_v39 = vld [vmem:[#allocation5 + $0x530] sm:$0xff]  ;;  %v2179_v42 = vcombine.high %v92_v36, %v96_v37  ;;  %v2178_v48 = vcombine.low %v92_v36, %v96_v37 }
  0x9a   :  { %1765 = vmatpush2.bf16.msra.mxu0 %v2240_v44  ;;  %v2307_v43 = vcombine.high %v220_v38, %v224_v39  ;;  %v84_v44 = vld [vmem:[#allocation5 + $0xd0] sm:$0xff] }
  0x9b   :  { %1766 = vmatprep.subr.bf16.mxu0 %v2233_v46  ;;  %v212_v46 = vld [vmem:[#allocation5 + $0x4d0] sm:$0xff] }
  0x9c   :  { %1808 = vmatpush2.bf16.msra.mxu1 %v2368_v45  ;;  %v88_v45 = vld [vmem:[#allocation5 + $0xf0] sm:$0xff] }
  0x9d   :  { %1809 = vmatprep.subr.bf16.mxu1 %v2361_v47  ;;  %v216_v47 = vld [vmem:[#allocation5 + $0x4f0] sm:$0xff]  ;;  %v2171_v49 = vcombine.high %v84_v44, %v88_v45 }
  0x9e   :  { %1767 = vmatpush2.bf16.msra.mxu0 %v2232_v52  ;;  %v204_v52 = vld [vmem:[#allocation5 + $0x490] sm:$0xff] }
  0x9f   :  { %1768 = vmatprep.subr.bf16.mxu0 %v2225_v54  ;;  %v2170_v54 = vcombine.low %v84_v44, %v88_v45  ;;  %v72_v61 = vld [vmem:[#allocation5 + $0x70] sm:$0xff] }
  0xa0   :  { %1810 = vmatpush2.bf16.msra.mxu1 %v2360_v53  ;;  %v208_v53 = vld [vmem:[#allocation5 + $0x4b0] sm:$0xff]  ;;  %v2155_v2 = vcombine.high %v68_v60, %v72_v61 }
  0xa1   :  { %1811 = vmatprep.subr.bf16.mxu1 %v2353_v55  ;;  %v2298_v55 = vcombine.low %v212_v46, %v216_v47  ;;  %v2291_v58 = vcombine.high %v204_v52, %v208_v53  ;;  %v60_v4 = vld [vmem:[#allocation5 + $0x10] sm:$0xff] }
  0xa2   :  { %1769 = vmatpush2.bf16.msra.mxu0 %v2224_v62  ;;  %v196_v62 = vld [vmem:[#allocation5 + $0x450] sm:$0xff] }
  0xa3   :  { %1770 = vmatprep.subr.bf16.mxu0 %v2217_v0  ;;  %v2162_v0 = vcombine.low %v76_v50, %v80_v51  ;;  %v64_v5 = vld [vmem:[#allocation5 + $0x30] sm:$0xff] }
  0xa4   :  { %1812 = vmatpush2.bf16.msra.mxu1 %v2352_v63  ;;  %v200_v63 = vld [vmem:[#allocation5 + $0x470] sm:$0xff]  ;;  %v2147_v10 = vcombine.high %v60_v4, %v64_v5 }
  0xa5   :  { %1813 = vmatprep.subr.bf16.mxu1 %v2345_v1  ;;  %v2290_v1 = vcombine.low %v204_v52, %v208_v53  ;;  %v2283_v3 = vcombine.high %v196_v62, %v200_v63  ;;  %v180_v13 = vld [vmem:[#allocation5 + $0x3d0] sm:$0xff] }
  0xa6   :  { %1771 = vmatpush2.bf16.msra.mxu0 %v2216_v6  ;;  %v188_v6 = vld [vmem:[#allocation5 + $0x410] sm:$0xff] }
  0xa7   :  { %1772 = vmatprep.subr.bf16.mxu0 %v2209_v8  ;;  %v2154_v8 = vcombine.low %v68_v60, %v72_v61  ;;  %v184_v14 = vld [vmem:[#allocation5 + $0x3f0] sm:$0xff] }
  0xa8   :  { %1814 = vmatpush2.bf16.msra.mxu1 %v2344_v7  ;;  %v192_v7 = vld [vmem:[#allocation5 + $0x430] sm:$0xff]  ;;  %v2267_v20 = vcombine.high %v180_v13, %v184_v14 }
  0xa9   :  { %1815 = vmatprep.subr.bf16.mxu1 %v2337_v9  ;;  %v2282_v9 = vcombine.low %v196_v62, %v200_v63  ;;  %v2275_v11 = vcombine.high %v188_v6, %v192_v7  ;;  %v172_v22 = vld [vmem:[#allocation5 + $0x390] sm:$0xff] }
  0xaa   :  { %1773 = vmatpush2.bf16.msra.mxu0 %v2208_v16  ;;  %v308_v16 = vld [vmem:[#allocation5 + $0x7d0] sm:$0xff] }
  0xab   :  { %1828 = vmatprep.subr.bf16.mxu0 %v2203_v18  ;;  %v2146_v18 = vcombine.low %v60_v4, %v64_v5  ;;  %v176_v23 = vld [vmem:[#allocation5 + $0x3b0] sm:$0xff] }
  0xac   :  { %1816 = vmatpush2.bf16.msra.mxu1 %v2336_v17  ;;  %v312_v17 = vld [vmem:[#allocation5 + $0x7f0] sm:$0xff]  ;;  %v2259_v28 = vcombine.high %v172_v22, %v176_v23 }
  0xad   :  { %1871 = vmatprep.subr.bf16.mxu1 %v2331_v19  ;;  %1775 = vmatmul.mubr.bf16.vlgmr.msra.gmra.mxu0 %v2585_v12  ;;  %v2274_v19 = vcombine.low %v188_v6, %v192_v7  ;;  %v2395_v21 = vcombine.high %v308_v16, %v312_v17  ;;  %v164_v30 = vld [vmem:[#allocation5 + $0x350] sm:$0xff] }
  0xae   :  { %1829 = vmatpush1.bf16.msra.mxu0 %v2202_v24  ;;  %1860 = vmatprep.mubr.bf16.mxu0 %v2579_v56  ;;  %v2306_v56 = vcombine.low %v220_v38, %v224_v39  ;;  %v300_v24 = vld [vmem:[#allocation5 + $0x790] sm:$0xff] }
  0xaf   :  { %1818 = vmatmul.mubr.bf16.vlgmr.msra.gmra.mxu1 %v2587_v15  ;;  %1830 = vmatprep.subr.bf16.mxu0 %v2195_v26  ;;  %v2266_v26 = vcombine.low %v180_v13, %v184_v14  ;;  %v168_v31 = vld [vmem:[#allocation5 + $0x370] sm:$0xff] }
  0xb0   :  { %1872 = vmatpush1.bf16.msra.mxu1 %v2330_v25  ;;  %1903 = vmatprep.mubr.bf16.mxu1 %v2581_v59  ;;  %v2299_v59 = vcombine.high %v212_v46, %v216_v47  ;;  %v304_v25 = vld [vmem:[#allocation5 + $0x7b0] sm:$0xff]  ;;  %v2251_v36 = vcombine.high %v164_v30, %v168_v31 }
  0xb1   :  { %1873 = vmatprep.subr.bf16.mxu1 %v2323_v27  ;;  %v2394_v27 = vcombine.low %v308_v16, %v312_v17  ;;  %v2387_v29 = vcombine.high %v300_v24, %v304_v25  ;;  %v156_v38 = vld [vmem:[#allocation5 + $0x310] sm:$0xff]  ;;  %v117_v16 = vld [vmem:[#allocation5 + $0x1d8] sm:$0xff] }
  0xb2   :  { %1831 = vmatpush1.bf16.msra.mxu0 %v2194_v32  ;;  %v292_v32 = vld [vmem:[#allocation5 + $0x750] sm:$0xff]  ;;  %v121_v17 = vld [vmem:[#allocation5 + $0x1f8] sm:$0xff] }
  0xb3   :  { %1832 = vmatprep.subr.bf16.mxu0 %v2187_v34  ;;  %v2258_v34 = vcombine.low %v172_v22, %v176_v23  ;;  %v160_v39 = vld [vmem:[#allocation5 + $0x330] sm:$0xff]  ;;  %v2205_v22 = vcombine.high %v117_v16, %v121_v17 }
  0xb4   :  { %1874 = vmatpush1.bf16.msra.mxu1 %v2322_v33  ;;  %v296_v33 = vld [vmem:[#allocation5 + $0x770] sm:$0xff]  ;;  %v2243_v44 = vcombine.high %v156_v38, %v160_v39 }
  0xb5   :  { %1875 = vmatprep.subr.bf16.mxu1 %v2315_v35  ;;  %v2386_v35 = vcombine.low %v300_v24, %v304_v25  ;;  %v2379_v37 = vcombine.high %v292_v32, %v296_v33  ;;  %v148_v46 = vld [vmem:[#allocation5 + $0x2d0] sm:$0xff]  ;;  %v109_v24 = vld [vmem:[#allocation5 + $0x198] sm:$0xff] }
  0xb6   :  { %1833 = vmatpush1.bf16.msra.mxu0 %v2186_v40  ;;  %v284_v40 = vld [vmem:[#allocation5 + $0x710] sm:$0xff]  ;;  %v113_v25 = vld [vmem:[#allocation5 + $0x1b8] sm:$0xff] }
  0xb7   :  { %1834 = vmatprep.subr.bf16.mxu0 %v2179_v42  ;;  %v2250_v42 = vcombine.low %v164_v30, %v168_v31  ;;  %v152_v47 = vld [vmem:[#allocation5 + $0x2f0] sm:$0xff]  ;;  %v2197_v30 = vcombine.high %v109_v24, %v113_v25 }
  0xb8   :  { %1876 = vmatpush1.bf16.msra.mxu1 %v2314_v41  ;;  %v288_v41 = vld [vmem:[#allocation5 + $0x730] sm:$0xff]  ;;  %v2235_v50 = vcombine.high %v148_v46, %v152_v47 }
  0xb9   :  { %1877 = vmatprep.subr.bf16.mxu1 %v2307_v43  ;;  %v2378_v43 = vcombine.low %v292_v32, %v296_v33  ;;  %v2371_v45 = vcombine.high %v284_v40, %v288_v41  ;;  %v140_v52 = vld [vmem:[#allocation5 + $0x290] sm:$0xff]  ;;  %v101_v32 = vld [vmem:[#allocation5 + $0x158] sm:$0xff] }
  0xba   :  { %1835 = vmatpush1.bf16.msra.mxu0 %v2178_v48  ;;  %v276_v48 = vld [vmem:[#allocation5 + $0x6d0] sm:$0xff]  ;;  %v105_v33 = vld [vmem:[#allocation5 + $0x178] sm:$0xff] }
  0xbb   :  { %1836 = vmatprep.subr.bf16.mxu0 %v2171_v49  ;;  %v2242_v49 = vcombine.low %v156_v38, %v160_v39  ;;  %v144_v53 = vld [vmem:[#allocation5 + $0x2b0] sm:$0xff]  ;;  %v2189_v38 = vcombine.high %v101_v32, %v105_v33 }
  0xbc   :  { %1878 = vmatpush1.bf16.msra.mxu1 %v2306_v56  ;;  %v280_v56 = vld [vmem:[#allocation5 + $0x6f0] sm:$0xff]  ;;  %v2227_v60 = vcombine.high %v140_v52, %v144_v53 }
  0xbd   :  { %1879 = vmatprep.subr.bf16.mxu1 %v2299_v59  ;;  %v2370_v59 = vcombine.low %v284_v40, %v288_v41  ;;  %v2363_v51 = vcombine.high %v276_v48, %v280_v56  ;;  %v132_v62 = vld [vmem:[#allocation5 + $0x250] sm:$0xff]  ;;  %v93_v40 = vld [vmem:[#allocation5 + $0x118] sm:$0xff] }
  0xbe   :  { %1837 = vmatpush1.bf16.msra.mxu0 %v2170_v54  ;;  %v268_v54 = vld [vmem:[#allocation5 + $0x690] sm:$0xff]  ;;  %v97_v41 = vld [vmem:[#allocation5 + $0x138] sm:$0xff] }
  0xbf   :  { %1838 = vmatprep.subr.bf16.mxu0 %v2163_v57  ;;  %v2234_v57 = vcombine.low %v148_v46, %v152_v47  ;;  %v136_v63 = vld [vmem:[#allocation5 + $0x270] sm:$0xff]  ;;  %v2181_v46 = vcombine.high %v93_v40, %v97_v41 }
  0xc0   :  { %1880 = vmatpush1.bf16.msra.mxu1 %v2298_v55  ;;  %v272_v55 = vld [vmem:[#allocation5 + $0x6b0] sm:$0xff]  ;;  %v2219_v4 = vcombine.high %v132_v62, %v136_v63 }
  0xc1   :  { %1881 = vmatprep.subr.bf16.mxu1 %v2291_v58  ;;  %v2362_v58 = vcombine.low %v276_v48, %v280_v56  ;;  %v2355_v61 = vcombine.high %v268_v54, %v272_v55  ;;  %v124_v6 = vld [vmem:[#allocation5 + $0x210] sm:$0xff]  ;;  %v85_v48 = vld [vmem:[#allocation5 + $0xd8] sm:$0xff] }
  0xc2   :  { %1839 = vmatpush1.bf16.msra.mxu0 %v2162_v0  ;;  %v260_v0 = vld [vmem:[#allocation5 + $0x650] sm:$0xff]  ;;  %v89_v56 = vld [vmem:[#allocation5 + $0xf8] sm:$0xff] }
  0xc3   :  { %1840 = vmatprep.subr.bf16.mxu0 %v2155_v2  ;;  %v2226_v2 = vcombine.low %v140_v52, %v144_v53  ;;  %v128_v7 = vld [vmem:[#allocation5 + $0x230] sm:$0xff]  ;;  %v2173_v52 = vcombine.high %v85_v48, %v89_v56 }
  0xc4   :  { %1882 = vmatpush1.bf16.msra.mxu1 %v2290_v1  ;;  %v264_v1 = vld [vmem:[#allocation5 + $0x670] sm:$0xff]  ;;  %v2211_v13 = vcombine.high %v124_v6, %v128_v7 }
  0xc5   :  { %1883 = vmatprep.subr.bf16.mxu1 %v2283_v3  ;;  %v2354_v3 = vcombine.low %v268_v54, %v272_v55  ;;  %v2347_v5 = vcombine.high %v260_v0, %v264_v1  ;;  %v77_v54 = vld [vmem:[#allocation5 + $0x98] sm:$0xff] }
  0xc6   :  { %1841 = vmatpush1.bf16.msra.mxu0 %v2154_v8  ;;  %v252_v8 = vld [vmem:[#allocation5 + $0x610] sm:$0xff]  ;;  %v81_v55 = vld [vmem:[#allocation5 + $0xb8] sm:$0xff] }
  0xc7   :  { %1842 = vmatprep.subr.bf16.mxu0 %v2147_v10  ;;  %v2218_v10 = vcombine.low %v132_v62, %v136_v63  ;;  %v2165_v62 = vcombine.high %v77_v54, %v81_v55 }
  0xc8   :  { %1884 = vmatpush1.bf16.msra.mxu1 %v2282_v9  ;;  %v256_v9 = vld [vmem:[#allocation5 + $0x630] sm:$0xff] }
  0xc9   :  { %1885 = vmatprep.subr.bf16.mxu1 %v2275_v11  ;;  %v2346_v11 = vcombine.low %v260_v0, %v264_v1  ;;  %v2339_v14 = vcombine.high %v252_v8, %v256_v9  ;;  %v69_v0 = vld [vmem:[#allocation5 + $0x58] sm:$0xff] }
  0xca   :  { %1843 = vmatpush1.bf16.msra.mxu0 %v2146_v18  ;;  %v245_v18 = vld [vmem:[#allocation5 + $0x5d8] sm:$0xff] }
  0xcb   :  { %1844 = vmatprep.subr.bf16.mxu0 %v2267_v20  ;;  %v2210_v20 = vcombine.low %v124_v6, %v128_v7  ;;  %v73_v1 = vld [vmem:[#allocation5 + $0x78] sm:$0xff] }
  0xcc   :  { %1886 = vmatpush1.bf16.msra.mxu1 %v2274_v19  ;;  %v249_v19 = vld [vmem:[#allocation5 + $0x5f8] sm:$0xff]  ;;  %v2157_v6 = vcombine.high %v69_v0, %v73_v1 }
  0xcd   :  { %1887 = vmatprep.subr.bf16.mxu1 %v2395_v21  ;;  %v2338_v21 = vcombine.low %v252_v8, %v256_v9  ;;  %v2333_v23 = vcombine.high %v245_v18, %v249_v19  ;;  %v61_v8 = vld [vmem:[#allocation5 + $0x18] sm:$0xff] }
  0xce   :  { %1845 = vmatpush2.bf16.msra.mxu0 %v2266_v26  ;;  %v237_v26 = vld [vmem:[#allocation5 + $0x598] sm:$0xff] }
  0xcf   :  { %1846 = vmatprep.subr.bf16.mxu0 %v2259_v28  ;;  %v2204_v28 = vcombine.low %v117_v16, %v121_v17  ;;  %v65_v9 = vld [vmem:[#allocation5 + $0x38] sm:$0xff] }
  0xd0   :  { %1888 = vmatpush2.bf16.msra.mxu1 %v2394_v27  ;;  %v241_v27 = vld [vmem:[#allocation5 + $0x5b8] sm:$0xff]  ;;  %v2149_v16 = vcombine.high %v61_v8, %v65_v9 }
  0xd1   :  { %1889 = vmatprep.subr.bf16.mxu1 %v2387_v29  ;;  %v2332_v29 = vcombine.low %v245_v18, %v249_v19  ;;  %v2325_v31 = vcombine.high %v237_v26, %v241_v27  ;;  %v181_v18 = vld [vmem:[#allocation5 + $0x3d8] sm:$0xff] }
  0xd2   :  { %1847 = vmatpush2.bf16.msra.mxu0 %v2258_v34  ;;  %v229_v34 = vld [vmem:[#allocation5 + $0x558] sm:$0xff] }
  0xd3   :  { %1848 = vmatprep.subr.bf16.mxu0 %v2251_v36  ;;  %v2196_v36 = vcombine.low %v109_v24, %v113_v25  ;;  %v185_v19 = vld [vmem:[#allocation5 + $0x3f8] sm:$0xff] }
  0xd4   :  { %1890 = vmatpush2.bf16.msra.mxu1 %v2386_v35  ;;  %v233_v35 = vld [vmem:[#allocation5 + $0x578] sm:$0xff]  ;;  %v2269_v24 = vcombine.high %v181_v18, %v185_v19 }
  0xd5   :  { %1891 = vmatprep.subr.bf16.mxu1 %v2379_v37  ;;  %v2324_v37 = vcombine.low %v237_v26, %v241_v27  ;;  %v2317_v39 = vcombine.high %v229_v34, %v233_v35  ;;  %v173_v26 = vld [vmem:[#allocation5 + $0x398] sm:$0xff] }
  0xd6   :  { %1849 = vmatpush2.bf16.msra.mxu0 %v2250_v42  ;;  %v2450_v42 = vld [vmem:[#allocation2 + $0x4] ss:$16 sps:$4 sm:$0xff]   ;;  %v177_v27 = vld [vmem:[#allocation5 + $0x3b8] sm:$0xff] }
  0xd7   :  { %1850 = vmatprep.subr.bf16.mxu0 %v2243_v44  ;;  %v225_v44 = vld [vmem:[#allocation5 + $0x538] sm:$0xff] }
  0xd8   :  { %1892 = vmatpush2.bf16.msra.mxu1 %v2378_v43  ;;  %v221_v43 = vld [vmem:[#allocation5 + $0x518] sm:$0xff] }
  0xd9   :  { %1893 = vmatprep.subr.bf16.mxu1 %v2371_v45  ;;  %v2451_v45 = vld [vmem:[#allocation2 + $0xc] ss:$16 sps:$4 sm:$0xff]   ;;  %v2309_v47 = vcombine.high %v221_v43, %v225_v44 }
  0xda   :  { %1851 = vmatpush2.bf16.msra.mxu0 %v2242_v49  ;;  %v213_v49 = vld [vmem:[#allocation5 + $0x4d8] sm:$0xff] }
  0xdb   :  { %1852 = vmatprep.subr.bf16.mxu0 %v2235_v50  ;;  %v2180_v50 = vcombine.low %v93_v40, %v97_v41 }
  0xdc   :  { %1894 = vmatpush2.bf16.msra.mxu1 %v2370_v59  ;;  %v217_v59 = vld [vmem:[#allocation5 + $0x4f8] sm:$0xff] }
  0xdd   :  { %1895 = vmatprep.subr.bf16.mxu1 %v2363_v51  ;;  %v2308_v51 = vcombine.low %v221_v43, %v225_v44  ;;  %v2301_v53 = vcombine.high %v213_v49, %v217_v59  ;;  %v161_v43 = vld [vmem:[#allocation5 + $0x338] sm:$0xff] }
  0xde   :  { %1853 = vmatpush2.bf16.msra.mxu0 %v2234_v57  ;;  %v205_v57 = vld [vmem:[#allocation5 + $0x498] sm:$0xff] }
  0xdf   :  { %1854 = vmatprep.subr.bf16.mxu0 %v2227_v60  ;;  %v2172_v60 = vcombine.low %v85_v48, %v89_v56  ;;  %v285_v44 = vld [vmem:[#allocation5 + $0x718] sm:$0xff] }
  0xe0   :  { %1896 = vmatpush2.bf16.msra.mxu1 %v2362_v58  ;;  %v209_v58 = vld [vmem:[#allocation5 + $0x4b8] sm:$0xff] }
  0xe1   :  { %1897 = vmatprep.subr.bf16.mxu1 %v2355_v61  ;;  %v2300_v61 = vcombine.low %v213_v49, %v217_v59  ;;  %v2293_v63 = vcombine.high %v205_v57, %v209_v58  ;;  %v149_v48 = vld [vmem:[#allocation5 + $0x2d8] sm:$0xff] }
  0xe2   :  { %1855 = vmatpush2.bf16.msra.mxu0 %v2226_v2  ;;  %v197_v2 = vld [vmem:[#allocation5 + $0x458] sm:$0xff] }
  0xe3   :  { %1856 = vmatprep.subr.bf16.mxu0 %v2219_v4  ;;  %v2164_v4 = vcombine.low %v77_v54, %v81_v55  ;;  %v153_v56 = vld [vmem:[#allocation5 + $0x2f8] sm:$0xff] }
  0xe4   :  { %1898 = vmatpush2.bf16.msra.mxu1 %v2354_v3  ;;  %v201_v3 = vld [vmem:[#allocation5 + $0x478] sm:$0xff] }
  0xe5   :  { %1899 = vmatprep.subr.bf16.mxu1 %v2347_v5  ;;  %v2292_v5 = vcombine.low %v205_v57, %v209_v58  ;;  %v2285_v7 = vcombine.high %v197_v2, %v201_v3  ;;  %v277_v49 = vld [vmem:[#allocation5 + $0x6d8] sm:$0xff] }
  0xe6   :  { %1857 = vmatpush2.bf16.msra.mxu0 %v2218_v10  ;;  %v189_v10 = vld [vmem:[#allocation5 + $0x418] sm:$0xff] }
  0xe7   :  { %1858 = vmatprep.subr.bf16.mxu0 %v2211_v13  ;;  %v2156_v13 = vcombine.low %v69_v0, %v73_v1  ;;  %v281_v59 = vld [vmem:[#allocation5 + $0x6f8] sm:$0xff] }
  0xe8   :  { %1900 = vmatpush2.bf16.msra.mxu1 %v2346_v11  ;;  %v193_v11 = vld [vmem:[#allocation5 + $0x438] sm:$0xff] }
  0xe9   :  { %1901 = vmatprep.subr.bf16.mxu1 %v2339_v14  ;;  %v2284_v14 = vcombine.low %v197_v2, %v201_v3  ;;  %v2277_v17 = vcombine.high %v189_v10, %v193_v11  ;;  %v141_v54 = vld [vmem:[#allocation5 + $0x298] sm:$0xff] }
  0xea   :  { %1859 = vmatpush2.bf16.msra.mxu0 %v2210_v20  ;;  %v309_v20 = vld [vmem:[#allocation5 + $0x7d8] sm:$0xff] }
  0xeb   :  { %1914 = vmatprep.subr.bf16.mxu0 %v2205_v22  ;;  %v2148_v22 = vcombine.low %v61_v8, %v65_v9  ;;  %v145_v55 = vld [vmem:[#allocation5 + $0x2b8] sm:$0xff] }
  0xec   :  { %1902 = vmatpush2.bf16.msra.mxu1 %v2338_v21  ;;  %v313_v21 = vld [vmem:[#allocation5 + $0x7f8] sm:$0xff] }
  0xed   :  { %1957 = vmatprep.subr.bf16.mxu1 %v2333_v23  ;;  %1861 = vmatmul.mubr.bf16.vlgmr.msra.gmra.mxu0 %v2585_v12  ;;  %v2188_v12 = vcombine.low %v101_v32, %v105_v33  ;;  %v2276_v23 = vcombine.low %v189_v10, %v193_v11  ;;  %v2397_v25 = vcombine.high %v309_v20, %v313_v21  ;;  %v269_v57 = vld [vmem:[#allocation5 + $0x698] sm:$0xff] }
  0xee   :  { %1915 = vmatpush1.bf16.msra.mxu0 %v2204_v28  ;;  %1946 = vmatprep.mubr.bf16.mxu0 %v2450_v42  ;;  %v301_v28 = vld [vmem:[#allocation5 + $0x798] sm:$0xff]  ;;  %v2261_v32 = vcombine.high %v173_v26, %v177_v27 }
  0xef   :  { %1904 = vmatmul.mubr.bf16.vlgmr.msra.gmra.mxu1 %v2587_v15  ;;  %1916 = vmatprep.subr.bf16.mxu0 %v2197_v30  ;;  %v2316_v15 = vcombine.low %v229_v34, %v233_v35  ;;  %v2268_v30 = vcombine.low %v181_v18, %v185_v19  ;;  %v165_v34 = vld [vmem:[#allocation5 + $0x358] sm:$0xff] }
  0xf0   :  { %1958 = vmatpush1.bf16.msra.mxu1 %v2332_v29  ;;  %1989 = vmatprep.mubr.bf16.mxu1 %v2451_v45  ;;  %v305_v29 = vld [vmem:[#allocation5 + $0x7b8] sm:$0xff] }
  0xf1   :  { %1959 = vmatprep.subr.bf16.mxu1 %v2325_v31  ;;  %v2396_v31 = vcombine.low %v309_v20, %v313_v21  ;;  %v2389_v33 = vcombine.high %v301_v28, %v305_v29  ;;  %v169_v35 = vld [vmem:[#allocation5 + $0x378] sm:$0xff]  ;;  %v2452_v20 = vld [vmem:[#allocation2] ss:$16 sps:$4 sm:$0xff]  }
  0xf2   :  { %1917 = vmatpush1.bf16.msra.mxu0 %v2196_v36  ;;  %v293_v36 = vld [vmem:[#allocation5 + $0x758] sm:$0xff]  ;;  %v2253_v40 = vcombine.high %v165_v34, %v169_v35 }
  0xf3   :  { %1918 = vmatprep.subr.bf16.mxu0 %v2189_v38  ;;  %v2260_v38 = vcombine.low %v173_v26, %v177_v27  ;;  %v157_v42 = vld [vmem:[#allocation5 + $0x318] sm:$0xff] }
  0xf4   :  { %1960 = vmatpush1.bf16.msra.mxu1 %v2324_v37  ;;  %v297_v37 = vld [vmem:[#allocation5 + $0x778] sm:$0xff] }
  0xf5   :  { %1961 = vmatprep.subr.bf16.mxu1 %v2317_v39  ;;  %v2388_v39 = vcombine.low %v301_v28, %v305_v29  ;;  %v2381_v41 = vcombine.high %v293_v36, %v297_v37  ;;  %v289_v45 = vld [vmem:[#allocation5 + $0x738] sm:$0xff] }
  0xf6   :  { %1919 = vmatpush1.bf16.msra.mxu0 %v2188_v12  ;;  %v2252_v12 = vcombine.low %v165_v34, %v169_v35  ;;  %v273_v58 = vld [vmem:[#allocation5 + $0x6b8] sm:$0xff]  ;;  %v316_v34 = vlaneseq }
  0xf7   :  { %1920 = vmatprep.subr.bf16.mxu0 %v2181_v46  ;;  %v2245_v46 = vcombine.high %v157_v42, %v161_v43  ;;  %v133_v0 = vld [vmem:[#allocation5 + $0x258] sm:$0xff] }
  0xf8   :  { %1962 = vmatpush1.bf16.msra.mxu1 %v2316_v15  ;;  %v2380_v15 = vcombine.low %v293_v36, %v297_v37  ;;  %v137_v1 = vld [vmem:[#allocation5 + $0x278] sm:$0xff]  ;;  %v317_v37 = vshrl.u32 %v316_v34, 7 }
  0xf9   :  { %1963 = vmatprep.subr.bf16.mxu1 %v2309_v47  ;;  %v2373_v47 = vcombine.high %v285_v44, %v289_v45  ;;  %v261_v2 = vld [vmem:[#allocation5 + $0x658] sm:$0xff] }
  0xfa   :  { %1921 = vmatpush1.bf16.msra.mxu0 %v2180_v50  ;;  %v2244_v50 = vcombine.low %v157_v42, %v161_v43  ;;  %v265_v3 = vld [vmem:[#allocation5 + $0x678] sm:$0xff]  ;;  %v318_v43 = vsub.s32 0, %v317_v37 }
  0xfb   :  { %1922 = vmatprep.subr.bf16.mxu0 %v2173_v52  ;;  %v2237_v52 = vcombine.high %v149_v48, %v153_v56  ;;  %v125_v8 = vld [vmem:[#allocation5 + $0x218] sm:$0xff] }
  0xfc   :  { %1964 = vmatpush1.bf16.msra.mxu1 %v2308_v51  ;;  %v2372_v51 = vcombine.low %v285_v44, %v289_v45  ;;  %v129_v9 = vld [vmem:[#allocation5 + $0x238] sm:$0xff]  ;;  %v322_v44 = vsub.s32 1, %v317_v37 }
  0xfd   :  { %1965 = vmatprep.subr.bf16.mxu1 %v2301_v53  ;;  %v2365_v53 = vcombine.high %v277_v49, %v281_v59  ;;  %v253_v10 = vld [vmem:[#allocation5 + $0x618] sm:$0xff]  ;;  %v2212_v18 = vcombine.low %v125_v8, %v129_v9 }
  0xfe   :  { %1923 = vmatpush1.bf16.msra.mxu0 %v2172_v60  ;;  %v2236_v60 = vcombine.low %v149_v48, %v153_v56  ;;  %v257_v11 = vld [vmem:[#allocation5 + $0x638] sm:$0xff] }
  0xff   :  { %1924 = vmatprep.subr.bf16.mxu0 %v2165_v62  ;;  %v2229_v62 = vcombine.high %v141_v54, %v145_v55  ;;  %v2340_v19 = vcombine.low %v253_v10, %v257_v11  ;;  %v2453_v21 = vld [vmem:[#allocation2 + $0x8] ss:$16 sps:$4 sm:$0xff]  }
 0x100   :  { %1966 = vmatpush1.bf16.msra.mxu1 %v2300_v61  ;;  %v2364_v61 = vcombine.low %v277_v49, %v281_v59 }
 0x101   :  { %1967 = vmatprep.subr.bf16.mxu1 %v2293_v63  ;;  %v2357_v63 = vcombine.high %v269_v57, %v273_v58 }
 0x102   :  { %1925 = vmatpush1.bf16.msra.mxu0 %v2164_v4  ;;  %v2228_v4 = vcombine.low %v141_v54, %v145_v55 }
 0x103   :  { %1926 = vmatprep.subr.bf16.mxu0 %v2157_v6  ;;  %v2221_v6 = vcombine.high %v133_v0, %v137_v1 }
 0x104   :  { %1968 = vmatpush1.bf16.msra.mxu1 %v2292_v5  ;;  %v2356_v5 = vcombine.low %v269_v57, %v273_v58 }
 0x105   :  { %1969 = vmatprep.subr.bf16.mxu1 %v2285_v7  ;;  %v2349_v7 = vcombine.high %v261_v2, %v265_v3 }
 0x106   :  { %1927 = vmatpush1.bf16.msra.mxu0 %v2156_v13  ;;  %v2220_v13 = vcombine.low %v133_v0, %v137_v1 }
 0x107   :  { %1928 = vmatprep.subr.bf16.mxu0 %v2149_v16  ;;  %v2213_v16 = vcombine.high %v125_v8, %v129_v9 }
 0x108   :  { %1970 = vmatpush1.bf16.msra.mxu1 %v2284_v14  ;;  %v2348_v14 = vcombine.low %v261_v2, %v265_v3 }
 0x109   :  { %1971 = vmatprep.subr.bf16.mxu1 %v2277_v17  ;;  %v2341_v17 = vcombine.high %v253_v10, %v257_v11 }
 0x10a   :  { %1929 = vmatpush1.bf16.msra.mxu0 %v2148_v22 }
 0x10b   :  { %1930 = vmatprep.subr.bf16.mxu0 %v2269_v24 }
 0x10c   :  { %1972 = vmatpush1.bf16.msra.mxu1 %v2276_v23 }
 0x10d   :  { %1973 = vmatprep.subr.bf16.mxu1 %v2397_v25 }
 0x10e   :  { %1931 = vmatpush2.bf16.msra.mxu0 %v2268_v30 }
 0x10f   :  { %1932 = vmatprep.subr.bf16.mxu0 %v2261_v32 }
 0x110   :  { %1974 = vmatpush2.bf16.msra.mxu1 %v2396_v31 }
 0x111   :  { %1975 = vmatprep.subr.bf16.mxu1 %v2389_v33 }
 0x112   :  { %1933 = vmatpush2.bf16.msra.mxu0 %v2260_v38 }
 0x113   :  { %1934 = vmatprep.subr.bf16.mxu0 %v2253_v40  ;;  %v326_v40 = vsub.s32 2, %v317_v37 }
 0x114   :  { %1976 = vmatpush2.bf16.msra.mxu1 %v2388_v39 }
 0x115   :  { %1977 = vmatprep.subr.bf16.mxu1 %v2381_v41  ;;  %v330_v41 = vsub.s32 3, %v317_v37 }
 0x116   :  { %1935 = vmatpush2.bf16.msra.mxu0 %v2252_v12  ;;  %v314_v12 = vld [vmem:[#allocation7] sm:$0xff] }
 0x117   :  { %1936 = vmatprep.subr.bf16.mxu0 %v2245_v46  ;;  %v338_v46 = vsub.s32 5, %v317_v37  ;;  %v331_v48 = vrot.slane %v314_v12, %v330_v41  ;;  %v319_v49 = vrot.slane %v314_v12, %v318_v43  ;;  %v323_v59 = vrot.slane %v314_v12, %v322_v44 }
 0x118   :  { %1978 = vmatpush2.bf16.msra.mxu1 %v2380_v15  ;;  %v334_v15 = vsub.s32 4, %v317_v37 }
 0x119   :  { %1979 = vmatprep.subr.bf16.mxu1 %v2373_v47  ;;  %v327_v47 = vrot.slane %v314_v12, %v326_v40 }
 0x11a   :  { %1937 = vmatpush2.bf16.msra.mxu0 %v2244_v50 }
 0x11b   :  { %1938 = vmatprep.subr.bf16.mxu0 %v2237_v52  ;;  %v339_v52 = vrot.slane %v314_v12, %v338_v46 }
 0x11c   :  { %1980 = vmatpush2.bf16.msra.mxu1 %v2372_v51  ;;  %v335_v51 = vrot.slane %v314_v12, %v334_v15 }
 0x11d   :  { %1981 = vmatprep.subr.bf16.mxu1 %v2365_v53  ;;  %v342_v53 = vsub.s32 6, %v317_v37 }
 0x11e   :  { %1939 = vmatpush2.bf16.msra.mxu0 %v2236_v60 }
 0x11f   :  { %1940 = vmatprep.subr.bf16.mxu0 %v2229_v62  ;;  %v346_v62 = vsub.s32 7, %v317_v37  ;;  %v343_v1 = vrot.slane %v314_v12, %v342_v53 }
 0x120   :  { %1982 = vmatpush2.bf16.msra.mxu1 %v2364_v61 }
 0x121   :  { %1983 = vmatprep.subr.bf16.mxu1 %v2357_v63  ;;  %v347_v10 = vrot.slane %v314_v12, %v346_v62 }
 0x122   :  { %1941 = vmatpush2.bf16.msra.mxu0 %v2228_v4 }
 0x123   :  { %1942 = vmatprep.subr.bf16.mxu0 %v2221_v6 }
 0x124   :  { %1984 = vmatpush2.bf16.msra.mxu1 %v2356_v5 }
 0x125   :  { %1985 = vmatprep.subr.bf16.mxu1 %v2349_v7 }
 0x126   :  { %1943 = vmatpush2.bf16.msra.mxu0 %v2220_v13 }
 0x127   :  { %1944 = vmatprep.subr.bf16.mxu0 %v2213_v16 }
 0x128   :  { %1986 = vmatpush2.bf16.msra.mxu1 %v2348_v14 }
 0x129   :  { %1987 = vmatprep.subr.bf16.mxu1 %v2341_v17 }
 0x12a   :  { %1945 = vmatpush2.bf16.msra.mxu0 %v2212_v18 }
 0x12c   :  { %1988 = vmatpush2.bf16.msra.mxu1 %v2340_v19 }
 0x12d   :  { %1947 = vmatmul.mubr.bf16.vlgmr.msra.gmra.mxu0 %v2452_v20  ;;  %v1690_v22 = vpop.f32.mrf.mxu0 }
 0x12e   :  { %v1691_v58 = vadd.f32 %v1690_v22, %v319_v49 }
 0x12f   :  { %1990 = vmatmul.mubr.bf16.vlgmr.msra.gmra.mxu1 %v2453_v21  ;;  %v1733_v23 = vpop.f32.mrf.mxu1  ;;  %v1692_v24 = vpop.f32.mrf.mxu0 }
 0x130   :  { %v1693_v60 = vadd.f32 %v1692_v24, %v323_v59  ;;  %v1734_v7 = vadd.f32 %v1733_v23, %v1691_v58 }
 0x131   :  { %v1735_v25 = vpop.f32.mrf.mxu1  ;;  %v1694_v26 = vpop.f32.mrf.mxu0 }
 0x132   :  { %v1736_v8 = vadd.f32 %v1735_v25, %v1693_v60  ;;  %v1695_v11 = vadd.f32 %v1694_v26, %v319_v49 }
 0x133   :  { %v2599_v27 = vpop.f32.mrf.mxu1  ;;  %v1696_v28 = vpop.f32.mrf.mxu0 }
 0x134   :  { %v1697_v13 = vadd.f32 %v1696_v28, %v323_v59  ;;  %v1738_v28 = vadd.f32 %v2599_v27, %v1695_v11 }
 0x135   :  { %v2601_v29 = vpop.f32.mrf.mxu1 }
 0x16d   :  { %v1776_v30 = vpop.f32.mrf.mxu0 }
 0x16e   :  { %v1777_v54 = vadd.f32 %v1776_v30, %v327_v47 }
 0x16f   :  { %v1819_v31 = vpop.f32.mrf.mxu1  ;;  %v1778_v32 = vpop.f32.mrf.mxu0 }
 0x170   :  { %v1779_v55 = vadd.f32 %v1778_v32, %v331_v48  ;;  %v1820_v2 = vadd.f32 %v1819_v31, %v1777_v54 }
 0x171   :  { %v1821_v33 = vpop.f32.mrf.mxu1  ;;  %v1780_v35 = vpop.f32.mrf.mxu0 }
 0x172   :  { %v2603_v3 = vadd.f32 %v1821_v33, %v1779_v55  ;;  %v1781_v4 = vadd.f32 %v1780_v35, %v327_v47  ;;  %v2000_v22 = vmax.f32 %v1734_v7, %v1820_v2  ;;  %v1740_v33 = vadd.f32 %v2601_v29, %v1697_v13 }
 0x173   :  { %v1823_v36 = vpop.f32.mrf.mxu1  ;;  %v1782_v38 = vpop.f32.mrf.mxu0 }
 0x174   :  { %v1783_v5 = vadd.f32 %v1782_v38, %v331_v48  ;;  %v2001_v24 = vmax.f32 %v1736_v8, %v2603_v3  ;;  %v1824_v30 = vadd.f32 %v1823_v36, %v1781_v4 }
 0x175   :  { %v1825_v39 = vpop.f32.mrf.mxu1 }
 0x176   :  { %v1826_v31 = vadd.f32 %v1825_v39, %v1783_v5 }
 0x178   :  { %v2010_v43 = vmax.f32 %v1740_v33, %v1826_v31 }
 0x1ad   :  { %v1862_v42 = vpop.f32.mrf.mxu0 }
 0x1ae   :  { %v1863_v63 = vadd.f32 %v1862_v42, %v335_v51  ;;  %v2009_v42 = vmax.f32 %v1738_v28, %v1824_v30 }
 0x1af   :  { %v1905_v45 = vpop.f32.mrf.mxu1  ;;  %v1864_v56 = vpop.f32.mrf.mxu0 }
 0x1b0   :  { %v1865_v0 = vadd.f32 %v1864_v56, %v339_v52  ;;  %v2605_v14 = vadd.f32 %v1905_v45, %v1863_v63 }
 0x1b1   :  { %v1907_v50 = vpop.f32.mrf.mxu1  ;;  %v1866_v57 = vpop.f32.mrf.mxu0 }
 0x1b2   :  { %v2607_v16 = vadd.f32 %v1907_v50, %v1865_v0  ;;  %v1867_v18 = vadd.f32 %v1866_v57, %v335_v51  ;;  %v2002_v34 = vmax.f32 %v2000_v22, %v2605_v14 }
 0x1b3   :  { %v1909_v61 = vpop.f32.mrf.mxu1  ;;  %v1868_v6 = vpop.f32.mrf.mxu0 }
 0x1b4   :  { %v1869_v19 = vadd.f32 %v1868_v6, %v339_v52  ;;  %v2003_v35 = vmax.f32 %v2001_v24, %v2607_v16  ;;  %v1910_v38 = vadd.f32 %v1909_v61, %v1867_v18 }
 0x1b5   :  { %v1911_v9 = vpop.f32.mrf.mxu1 }
 0x1b6   :  { %v1912_v40 = vadd.f32 %v1911_v9, %v1869_v19  ;;  %v2011_v46 = vmax.f32 %v2009_v42, %v1910_v38 }
 0x1b8   :  { %v2012_v47 = vmax.f32 %v2010_v43, %v1912_v40 }
 0x1ed   :  { %v1948_v17 = vpop.f32.mrf.mxu0 }
 0x1ee   :  { %v1949_v20 = vadd.f32 %v1948_v17, %v343_v1 }
 0x1ef   :  { %v1991_v21 = vpop.f32.mrf.mxu1  ;;  %v1950_v23 = vpop.f32.mrf.mxu0 }
 0x1f0   :  { %v2610_v25 = vadd.f32 %v1991_v21, %v1949_v20  ;;  %v1951_v32 = vadd.f32 %v1950_v23, %v347_v10 }
 0x1f1   :  { %v1993_v26 = vpop.f32.mrf.mxu1  ;;  %v1952_v37 = vpop.f32.mrf.mxu0 }
 0x1f2   :  { %v2616_v41 = vadd.f32 %v1993_v26, %v1951_v32  ;;  %v1953_v36 = vadd.f32 %v1952_v37, %v343_v1  ;;  %v2004_v27 = vmax.f32 %v2002_v34, %v2610_v25 }
 0x1f3   :  { %v1995_v39 = vpop.f32.mrf.mxu1  ;;  %v1954_v44 = vpop.f32.mrf.mxu0 }
 0x1f4   :  { %v1996_v45 = vadd.f32 %v1995_v39, %v1953_v36  ;;  %v1955_v12 = vadd.f32 %v1954_v44, %v347_v10  ;;  %v2005_v29 = vmax.f32 %v2003_v35, %v2616_v41 }
 0x1f5   :  { %v1997_v15 = vpop.f32.mrf.mxu1 }
 0x1f6   :  { %v1998_v48 = vadd.f32 %v1997_v15, %v1955_v12  ;;  %v2006_v56 = vmax.f32 %v2004_v27, %v2005_v29  ;;  %v2013_v49 = vmax.f32 %v2011_v46, %v1996_v45 }
 0x1f8   :  { %v2014_v59 = vmax.f32 %v2012_v47, %v1998_v48  ;;  %2007 = vmax.xlane.f32.xlu0 %v2006_v56 }
 0x1fa   :  { %v2015_v50 = vmax.f32 %v2013_v49, %v2014_v59 }
 0x1fc   :  { %2016 = vmax.xlane.f32.xlu0 %v2015_v50 }
 0x281   :  { %v2008_v51 = vpop.xlane.xlu0 %2007 }
 0x282   :  { %v2018_v52 = vsub.f32 %v1734_v7, %v2008_v51  ;;  %v2019_v53 = vsub.f32 %v1736_v8, %v2008_v51  ;;  %v2020_v54 = vsub.f32 %v1820_v2, %v2008_v51  ;;  %v2021_v55 = vsub.f32 %v2603_v3, %v2008_v51 }
 0x283   :  { %v2022_v9 = vsub.f32 %v2605_v14, %v2008_v51  ;;  %v2023_v10 = vsub.f32 %v2607_v16, %v2008_v51  ;;  %v2024_v18 = vsub.f32 %v2610_v25, %v2008_v51  ;;  %v2025_v14 = vsub.f32 %v2616_v41, %v2008_v51 }
 0x284   :  { %v2034_v57 = vmul.f32 1.442695, %v2018_v52  ;;  %v2036_v58 = vmul.f32 1.442695, %v2019_v53  ;;  %v2038_v60 = vmul.f32 1.442695, %v2020_v54 }
 0x285   :  { %v2017_v61 = vpop.xlane.xlu0 %2016  ;;  %v2040_v4 = vmul.f32 1.442695, %v2021_v55  ;;  %v2042_v17 = vmul.f32 1.442695, %v2022_v9  ;;  %v2044_v20 = vmul.f32 1.442695, %v2023_v10 }
 0x286   :  { %2414 = vpow2.f32 %v2034_v57  ;;  %v2026_v62 = vsub.f32 %v1738_v28, %v2017_v61  ;;  %v2027_v63 = vsub.f32 %v1740_v33, %v2017_v61  ;;  %v2028_v0 = vsub.f32 %v1824_v30, %v2017_v61 }
 0x287   :  { %2416 = vpow2.f32 %v2036_v58  ;;  %v2029_v1 = vsub.f32 %v1826_v31, %v2017_v61  ;;  %v2030_v5 = vsub.f32 %v1910_v38, %v2017_v61  ;;  %v2031_v8 = vsub.f32 %v1912_v40, %v2017_v61 }
 0x288   :  { %v2050_v6 = vmul.f32 1.442695, %v2026_v62  ;;  %2418 = vpow2.f32 %v2038_v60  ;;  %v2052_v7 = vmul.f32 1.442695, %v2027_v63  ;;  %v2054_v2 = vmul.f32 1.442695, %v2028_v0 }
 0x289   :  { %v2056_v3 = vmul.f32 1.442695, %v2029_v1  ;;  %v2032_v11 = vsub.f32 %v1996_v45, %v2017_v61  ;;  %v2058_v13 = vmul.f32 1.442695, %v2030_v5  ;;  %v2060_v19 = vmul.f32 1.442695, %v2031_v8 }
 0x28a   :  { %2420 = vpow2.f32 %v2050_v6  ;;  %v2033_v22 = vsub.f32 %v1998_v48, %v2017_v61  ;;  %v2046_v24 = vmul.f32 1.442695, %v2024_v18  ;;  %v2048_v16 = vmul.f32 1.442695, %v2025_v14 }
 0x28b   :  { %2422 = vpow2.f32 %v2052_v7  ;;  %v2062_v21 = vmul.f32 1.442695, %v2032_v11 }
 0x28c   :  { %2424 = vpow2.f32 %v2040_v4  ;;  %v2064_v32 = vmul.f32 1.442695, %v2033_v22 }
 0x28d   :  { %2426 = vpow2.f32 %v2054_v2 }
 0x28e   :  { %2428 = vpow2.f32 %v2056_v3 }
 0x28f   :  { %2430 = vpow2.f32 %v2058_v13 }
 0x290   :  { %2432 = vpow2.f32 %v2042_v17 }
 0x291   :  { %2434 = vpow2.f32 %v2060_v19 }
 0x292   :  { %2436 = vpow2.f32 %v2044_v20 }
 0x293   :  { %v2415_v30 = vpop.eup %2414  ;;  %2438 = vpow2.f32 %v2062_v21 }
 0x294   :  { %v2417_v31 = vpop.eup %2416  ;;  %2440 = vpow2.f32 %v2046_v24 }
 0x295   :  { %v2066_v23 = vadd.f32 %v2417_v31, %v2415_v30  ;;  %v2419_v25 = vpop.eup %2418  ;;  %2442 = vpow2.f32 %v2048_v16 }
 0x296   :  { %2444 = vpow2.f32 %v2064_v32 }
 0x297   :  { %v2421_v26 = vpop.eup %2420  ;;  %v2067_v28 = vadd.f32 %v2419_v25, %v2066_v23 }
 0x298   :  { %v2423_v33 = vpop.eup %2422 }
 0x299   :  { %v2425_v34 = vpop.eup %2424  ;;  %v2075_v35 = vadd.f32 %v2423_v33, %v2421_v26 }
 0x29a   :  { %v2427_v37 = vpop.eup %2426  ;;  %v2068_v38 = vadd.f32 %v2425_v34, %v2067_v28 }
 0x29b   :  { %v2076_v40 = vadd.f32 %v2427_v37, %v2075_v35  ;;  %v2429_v41 = vpop.eup %2428 }
 0x29c   :  { %v2431_v36 = vpop.eup %2430 }
 0x29d   :  { %v2077_v39 = vadd.f32 %v2429_v41, %v2076_v40  ;;  %v2433_v42 = vpop.eup %2432 }
 0x29e   :  { %v2435_v43 = vpop.eup %2434  ;;  %v2069_v44 = vadd.f32 %v2433_v42, %v2068_v38 }
 0x29f   :  { %v2078_v45 = vadd.f32 %v2431_v36, %v2077_v39  ;;  %v2437_v12 = vpop.eup %2436 }
 0x2a0   :  { %v2439_v27 = vpop.eup %2438  ;;  %v2070_v29 = vadd.f32 %v2437_v12, %v2069_v44 }
 0x2a1   :  { %v2079_v15 = vadd.f32 %v2435_v43, %v2078_v45  ;;  %v2441_v46 = vpop.eup %2440 }
 0x2a2   :  { %v2071_v47 = vadd.f32 %v2441_v46, %v2070_v29  ;;  %v2443_v56 = vpop.eup %2442 }
 0x2a3   :  { %v2080_v48 = vadd.f32 %v2439_v27, %v2079_v15  ;;  %v2445_v59 = vpop.eup %2444 }
 0x2a4   :  { %v2072_v49 = vadd.f32 %v2443_v56, %v2071_v47 }
 0x2a5   :  { %v2081_v50 = vadd.f32 %v2445_v59, %v2080_v48 }
 0x2a6   :  { %2073 = vadd.xlane.f32.xlu1 %v2072_v49 }
 0x2aa   :  { %2082 = vadd.xlane.f32.xlu1 %v2081_v50 }
 0x32f   :  { %v2074_v51 = vpop.xlane.xlu1 %2073 }
 0x330   :  { %2446 = vrcp.f32 %v2074_v51 }
 0x333   :  { %v2083_v52 = vpop.xlane.xlu1 %2082 }
 0x334   :  { %2448 = vrcp.f32 %v2083_v52 }
 0x33d   :  { %v2447_v53 = vpop.eup %2446 }
 0x33e   :  { %v2088_v54 = vmul.f32 %v2447_v53, %v2415_v30  ;;  %v2089_v55 = vmul.f32 %v2447_v53, %v2417_v31  ;;  %v2090_v57 = vmul.f32 %v2447_v53, %v2419_v25  ;;  %v2091_v58 = vmul.f32 %v2447_v53, %v2425_v34 }
 0x33f   :  { %v2092_v60 = vmul.f32 %v2447_v53, %v2433_v42  ;;  %v2093_v61 = vmul.f32 %v2447_v53, %v2437_v12  ;;  %v2094_v62 = vmul.f32 %v2447_v53, %v2441_v46  ;;  %v2095_v63 = vmul.f32 %v2447_v53, %v2443_v56 }
 0x340   :  { %2104 = vst [vmem:[#allocation8] sm:$0xff] %v2088_v54  ;;  %2105 = vst [vmem:[#allocation8 + $0x8] sm:$0xff] %v2089_v55 }
 0x341   :  { %2106 = vst [vmem:[#allocation8 + $0x10] sm:$0xff] %v2090_v57  ;;  %2107 = vst [vmem:[#allocation8 + $0x18] sm:$0xff] %v2091_v58  ;;  %v2449_v0 = vpop.eup %2448 }
 0x342   :  { %2108 = vst [vmem:[#allocation8 + $0x20] sm:$0xff] %v2092_v60  ;;  %2109 = vst [vmem:[#allocation8 + $0x28] sm:$0xff] %v2093_v61  ;;  %v2096_v1 = vmul.f32 %v2449_v0, %v2421_v26  ;;  %v2097_v4 = vmul.f32 %v2449_v0, %v2423_v33  ;;  %v2098_v5 = vmul.f32 %v2449_v0, %v2427_v37 }
 0x343   :  { %2110 = vst [vmem:[#allocation8 + $0x30] sm:$0xff] %v2094_v62  ;;  %2111 = vst [vmem:[#allocation8 + $0x38] sm:$0xff] %v2095_v63  ;;  %v2099_v6 = vmul.f32 %v2449_v0, %v2429_v41  ;;  %v2100_v9 = vmul.f32 %v2449_v0, %v2431_v36  ;;  %v2101_v7 = vmul.f32 %v2449_v0, %v2435_v43 }
 0x344   :  { %v2102_v2 = vmul.f32 %v2449_v0, %v2439_v27  ;;  %v2103_v8 = vmul.f32 %v2449_v0, %v2445_v59  ;;  %2112 = vst [vmem:[#allocation8 + $0x40] sm:$0xff] %v2096_v1  ;;  %2113 = vst [vmem:[#allocation8 + $0x48] sm:$0xff] %v2097_v4 }
 0x345   :  { %2114 = vst [vmem:[#allocation8 + $0x50] sm:$0xff] %v2098_v5  ;;  %2115 = vst [vmem:[#allocation8 + $0x58] sm:$0xff] %v2099_v6 }
 0x346   :  { %2116 = vst [vmem:[#allocation8 + $0x60] sm:$0xff] %v2100_v9  ;;  %2117 = vst [vmem:[#allocation8 + $0x68] sm:$0xff] %v2101_v7 }
 0x347   :  { %2118 = vst [vmem:[#allocation8 + $0x70] sm:$0xff] %v2102_v2  ;;  %2119 = vst [vmem:[#allocation8 + $0x78] sm:$0xff] %v2103_v8 }
 0x348   :  { %2525 = shalt.err (!%p2522_p5)
}
 0x349   :  { %s2548_s4 = smov 1024   ;;  %s2549_s5 = smov 64  }
 0x34a   :  { %2131 = dma.vmem_to_hbm [thread:$0]  %s2126_s2, 2048, %s2631_s3, [#allocation4], %s2548_s4, %s2548_s4, %s2549_s5  }
 0x34b   :  { %2538 = dma.done.wait [#allocation4], 2048  }
 0x34c   :  { %2539 = vsyncadd [#allocation4], 4294965248 }
 0x34d   :  { %2135 = vsyncpa [#allocation3], 1 }
 0x34e   :  { %2136 = vsyncpa [#allocation6], 1 }
 0x34f   :  { %2137 = vsyncpa [#allocation4], 1 }

</bundles_post_ra>
